<compile_context>
chip_gen: v7x
topology: tpu7x:2x2x1
jax: 0.10.0
libtpu: 0.0.40
codegen_flags: <defaults>
</compile_context>

<pallas_src>
import jax
import jax.numpy as jnp
from jax import lax
from jax.experimental import pallas as pl
from jax.experimental.pallas import tpu as pltpu

# ---------------- static shape config ----------------
B      = 2            # batch
IN_CH  = 1
L_IN   = 64           # input sequence length
K1     = 15           # conv1 kernel size
L1     = L_IN - (K1 - 1)   # 50  after conv1
L2     = L1 - 2            # 48  after conv2 (k=3)
L2P    = L2 // 2           # 24  after maxpool(2,2)
L3     = L2P - 2           # 22  after conv3
L4     = L3 - 2            # 20  after conv4
POOL_OUT = 4               # AdaptiveMaxPool1d(4)
C1, C2, C3, C4 = 16, 32, 64, 128
FLAT   = POOL_OUT * C4     # 512
HIDDEN = 256
BN_EPS = 1e-5


# ---------------- Pallas kernel ----------------
def cnn_kernel(x_ref,
               w1_ref, s1_ref, b1_ref,
               w2_ref, s2_ref, b2_ref,
               w3_ref, s3_ref, b3_ref,
               w4_ref, s4_ref, b4_ref,
               w5_ref, b5_ref,
               out_ref,
               pool_scr):
    """Whole batch in one invocation.

    x_ref : (B, 1, L_IN) f32  -- native PyTorch NCL layout (C=1).
    w1_ref: (15, 16)          -- conv1 taps stacked (k, cout).
    wN_ref: (K*Cin, Cout)     -- conv2/3/4 taps fused along the contraction dim.
    sN/bN : (1, 1, Cout)      -- folded BatchNorm scale / (conv-bias+BN) bias.
    w5_ref: (512, 256)        -- Linear with the (t, c) flatten order folded in.
    b5_ref: (1, 256);  out_ref: (B, 256).
    pool_scr: (B*L2, 32) VMEM scratch for the strided MaxPool1d(2,2) reads.
    """
    x = x_ref[...]                                             # (B, 1, 64)

    # ---- layer1: conv1 on the MXU via tap-stacked im2col -------------------
    # x lives with length on lanes (1 vreg per batch element), so each of the
    # 15 tap windows is a cheap lane slice; stack them on sublanes, one small
    # 2-D transpose, one (50,15)@(15,16) dot per batch element.
    rows = []
    for b in range(B):                                         # B=2, tiny tensors
        xb = x[b]                                              # (1, 64)
        s_b = jnp.concatenate([xb[:, k:k + L1] for k in range(K1)], axis=0)  # (15, 50)
        rows.append(jnp.dot(s_b.T, w1_ref[...],
                            preferred_element_type=jnp.float32))             # (50, 16)
    h1 = jnp.stack(rows, axis=0)                               # (B, 50, 16)
    h1 = jnp.maximum(h1 * s1_ref[...] + b1_ref[...], 0.0)

    # ---- generic k=3 conv + BN + ReLU: fused taps -> ONE batched matmul ----
    def conv3_bn_relu(h, w_ref, s_ref, b_ref, l_out):
        # im2col along the contraction dim: (B, l_out, 3*Cin)
        s = jnp.concatenate([h[:, k:k + l_out, :] for k in range(3)], axis=-1)
        w = jnp.broadcast_to(w_ref[...], (B,) + w_ref.shape)   # (B, 3*Cin, Cout)
        y = jnp.einsum('blk,bkc->blc', s, w,
                       preferred_element_type=jnp.float32)
        return jnp.maximum(y * s_ref[...] + b_ref[...], 0.0)

    h2 = conv3_bn_relu(h1, w2_ref, s2_ref, b2_ref, L2)         # (B, 48, 32)

    # ---- MaxPool1d(kernel=2, stride=2) --------------------------------------
    # One batch-stacked scratch write (48 is a multiple of 8, so the
    # (B,48,32)<->(96,32) reshapes are slab relabelings), two stride-2 sublane
    # reads, one max.  Row pairs (2j, 2j+1) never cross the batch boundary.
    pool_scr[...] = h2.reshape(B * L2, C2)
    even = pool_scr[pl.ds(0, B * L2P, stride=2), :]            # (48, 32)
    odd  = pool_scr[pl.ds(1, B * L2P, stride=2), :]            # (48, 32)
    h2p = jnp.maximum(even, odd).reshape(B, L2P, C2)           # (B, 24, 32)

    h3 = conv3_bn_relu(h2p, w3_ref, s3_ref, b3_ref, L3)        # (B, 22, 64)
    h4 = conv3_bn_relu(h3, w4_ref, s4_ref, b4_ref, L4)         # (B, 20, 128)

    # ---- AdaptiveMaxPool1d(4) + flatten (t, c order) + Linear + ReLU --------
    segs = [jnp.max(h4[:, 5 * t:5 * (t + 1), :], axis=1, keepdims=True)
            for t in range(POOL_OUT)]                          # 4 x (B, 1, 128)
    flat = jnp.concatenate(segs, axis=-1)[:, 0, :]             # (B, 512)

    y = jnp.dot(flat, w5_ref[...], preferred_element_type=jnp.float32)
    y = jnp.maximum(y + b5_ref[...], 0.0)                      # ReLU; Dropout = identity (eval)
    out_ref[...] = y.astype(out_ref.dtype)                     # one unmasked (B, 256) store


# ---------------- wrapper ----------------
def cnn_forward(x_ncl, kernel_params):
    """x_ncl: (B, 1, L_IN) float32 (PyTorch NCL layout). Returns (B, 256)."""
    assert x_ncl.shape == (B, IN_CH, L_IN), x_ncl.shape

    def full_spec(a):
        nd = a.ndim
        return pl.BlockSpec(tuple(a.shape), lambda i, _nd=nd: (0,) * _nd)

    in_specs = [full_spec(x_ncl)] + [full_spec(a) for a in kernel_params]

    return pl.pallas_call(
        cnn_kernel,
        out_shape=jax.ShapeDtypeStruct((B, HIDDEN), jnp.float32),
        grid=(1,),                                   # single invocation, whole batch
        in_specs=in_specs,
        out_specs=pl.BlockSpec((B, HIDDEN), lambda i: (0, 0)),
        scratch_shapes=[pltpu.VMEM((B * L2, C2), jnp.float32)],
        compiler_params=pltpu.CompilerParams(
            dimension_semantics=("arbitrary",)),
    )(x_ncl, *kernel_params)


# ---------------- parameter init + BN folding (plain-JAX glue) ----------------
def init_params(key):
    ks = list(jax.random.split(key, 32))
    def nxt():
        return ks.pop()

    def conv(cout, cin, ksz):
        w = 0.1 * jax.random.normal(nxt(), (cout, cin, ksz), jnp.float32)
        b = 0.1 * jax.random.normal(nxt(), (cout,), jnp.float32)
        return w, b

    def bn(c):
        gamma = 1.0 + 0.1 * jax.random.normal(nxt(), (c,), jnp.float32)
        beta = 0.1 * jax.random.normal(nxt(), (c,), jnp.float32)
        mean = 0.1 * jax.random.normal(nxt(), (c,), jnp.float32)
        var = 1.0 + 0.5 * jax.random.uniform(nxt(), (c,), jnp.float32)
        return gamma, beta, mean, var

    w1, b1 = conv(C1, IN_CH, K1);  g1, be1, m1, v1 = bn(C1)
    w2, b2 = conv(C2, C1, 3);      g2, be2, m2, v2 = bn(C2)
    w3, b3 = conv(C3, C2, 3);      g3, be3, m3, v3 = bn(C3)
    w4, b4 = conv(C4, C3, 3);      g4, be4, m4, v4 = bn(C4)
    W5 = 0.05 * jax.random.normal(nxt(), (HIDDEN, FLAT), jnp.float32)
    B5 = 0.05 * jax.random.normal(nxt(), (HIDDEN,), jnp.float32)

    raw = (w1, b1, g1, be1, m1, v1, w2, b2, g2, be2, m2, v2,
           w3, b3, g3, be3, m3, v3, w4, b4, g4, be4, m4, v4, W5, B5)

    def fold(w, b, gamma, beta, mean, var):
        # Fused im2col weight: wf[k*Cin + cin, cout] = w[cout, cin, k]
        s = gamma / jnp.sqrt(var + BN_EPS)
        cout, cin, ksz = w.shape
        wf = jnp.transpose(w, (2, 1, 0)).reshape(ksz * cin, cout)
        bias = (b - mean) * s + beta
        return wf, s.reshape(1, 1, -1), bias.reshape(1, 1, -1)

    w1f, sc1, bi1 = fold(w1, b1, g1, be1, m1, v1)   # (15, 16)
    w2f, sc2, bi2 = fold(w2, b2, g2, be2, m2, v2)   # (48, 32)
    w3f, sc3, bi3 = fold(w3, b3, g3, be3, m3, v3)   # (96, 64)
    w4f, sc4, bi4 = fold(w4, b4, g4, be4, m4, v4)   # (192, 128)

    # flatten order in PyTorch view(B,-1) on (B, C, 4) is flat[c*4+t];
    # the kernel builds its 512-vector in (t, c) order, so:
    #   W5f[t*128 + c, o] = W5[o, c*4 + t]
    W5f = jnp.transpose(W5.T.reshape(C4, POOL_OUT, HIDDEN), (1, 0, 2)).reshape(FLAT, HIDDEN)
    B5r = B5.reshape(1, -1)

    kernel_params = (w1f, sc1, bi1, w2f, sc2, bi2, w3f, sc3, bi3,
                     w4f, sc4, bi4, W5f, B5r)
    return kernel_params, raw


# ---------------- pure-JAX reference (mirrors PyTorch eval forward) ----------------
def reference_forward(x, raw):
    (w1, b1, g1, be1, m1, v1, w2, b2, g2, be2, m2, v2,
     w3, b3, g3, be3, m3, v3, w4, b4, g4, be4, m4, v4, W5, B5) = raw

    def conv1d(x, w, b):
        y = lax.conv_general_dilated(x, w, window_strides=(1,), padding='VALID',
                                     dimension_numbers=('NCH', 'OIH', 'NCH'),
                                     precision=lax.Precision.HIGHEST)
        return y + b[None, :, None]

    def bn(x, gamma, beta, mean, var):
        inv = gamma / jnp.sqrt(var + BN_EPS)
        return (x - mean[None, :, None]) * inv[None, :, None] + beta[None, :, None]

    relu = lambda v: jnp.maximum(v, 0.0)

    h = relu(bn(conv1d(x, w1, b1), g1, be1, m1, v1))
    h = relu(bn(conv1d(h, w2, b2), g2, be2, m2, v2))
    bsz, c, l = h.shape
    h = h[:, :, :(l // 2) * 2].reshape(bsz, c, l // 2, 2).max(axis=-1)
    h = relu(bn(conv1d(h, w3, b3), g3, be3, m3, v3))
    h = relu(bn(conv1d(h, w4, b4), g4, be4, m4, v4))
    bsz, c, l = h.shape
    bins = []
    for t in range(POOL_OUT):
        s = (t * l) // POOL_OUT
        e = -(-((t + 1) * l) // POOL_OUT)
        bins.append(h[:, :, s:e].max(axis=-1))
    h = jnp.stack(bins, axis=-1).reshape(bsz, -1)   # (B, 512), PyTorch view order
    return relu(h @ W5.T + B5)                      # Dropout = identity in eval


if __name__ == "__main__":
    key = jax.random.PRNGKey(0)
    kx, kp = jax.random.split(key)
    x = jax.random.normal(kx, (B, IN_CH, L_IN), jnp.float32)   # PyTorch NCL layout

    kernel_params, raw = init_params(kp)

    out = cnn_forward(x, kernel_params)
    out = jax.block_until_ready(out)

    ref = jax.block_until_ready(reference_forward(x, raw))
    assert out.shape == (B, HIDDEN), out.shape
    max_diff = float(jnp.max(jnp.abs(out - ref)))
    assert bool(jnp.allclose(out, ref, rtol=3e-2, atol=3e-2)), f"mismatch, max diff={max_diff}"

    print("KERNEL_OK")
</pallas_src>

<mosaic_0001>
module attributes {stable_mosaic.version = 11 : i64} {
  func.func @cnn_kernel(%arg0: i32, %arg1: memref<2x1x64xf32, #tpu.memory_space<vmem>>, %arg2: memref<15x16xf32, #tpu.memory_space<vmem>>, %arg3: memref<1x1x16xf32, #tpu.memory_space<vmem>>, %arg4: memref<1x1x16xf32, #tpu.memory_space<vmem>>, %arg5: memref<48x32xf32, #tpu.memory_space<vmem>>, %arg6: memref<1x1x32xf32, #tpu.memory_space<vmem>>, %arg7: memref<1x1x32xf32, #tpu.memory_space<vmem>>, %arg8: memref<96x64xf32, #tpu.memory_space<vmem>>, %arg9: memref<1x1x64xf32, #tpu.memory_space<vmem>>, %arg10: memref<1x1x64xf32, #tpu.memory_space<vmem>>, %arg11: memref<192x128xf32, #tpu.memory_space<vmem>>, %arg12: memref<1x1x128xf32, #tpu.memory_space<vmem>>, %arg13: memref<1x1x128xf32, #tpu.memory_space<vmem>>, %arg14: memref<512x256xf32, #tpu.memory_space<vmem>>, %arg15: memref<1x256xf32, #tpu.memory_space<vmem>>, %arg16: memref<2x256xf32, #tpu.memory_space<vmem>>, %arg17: memref<96x32xf32, #tpu.memory_space<vmem>>) attributes {dimension_semantics = [#tpu.dimension_semantics<arbitrary>], iteration_bounds = array<i64: 1>, scalar_prefetch = 0 : i64, scratch_operands = 1 : i64, tpu.core_type = #tpu.core_type<tc>, window_params = [{pipeline_mode = #tpu.pipeline_mode<synchronous>, transform_indices = @transform_0, window_bounds = array<i64: 2, 1, 64>}, {pipeline_mode = #tpu.pipeline_mode<synchronous>, transform_indices = @transform_1, window_bounds = array<i64: 15, 16>}, {pipeline_mode = #tpu.pipeline_mode<synchronous>, transform_indices = @transform_2, window_bounds = array<i64: 1, 1, 16>}, {pipeline_mode = #tpu.pipeline_mode<synchronous>, transform_indices = @transform_3, window_bounds = array<i64: 1, 1, 16>}, {pipeline_mode = #tpu.pipeline_mode<synchronous>, transform_indices = @transform_4, window_bounds = array<i64: 48, 32>}, {pipeline_mode = #tpu.pipeline_mode<synchronous>, transform_indices = @transform_5, window_bounds = array<i64: 1, 1, 32>}, {pipeline_mode = #tpu.pipeline_mode<synchronous>, transform_indices = @transform_6, window_bounds = array<i64: 1, 1, 32>}, {pipeline_mode = #tpu.pipeline_mode<synchronous>, transform_indices = @transform_7, window_bounds = array<i64: 96, 64>}, {pipeline_mode = #tpu.pipeline_mode<synchronous>, transform_indices = @transform_8, window_bounds = array<i64: 1, 1, 64>}, {pipeline_mode = #tpu.pipeline_mode<synchronous>, transform_indices = @transform_9, window_bounds = array<i64: 1, 1, 64>}, {pipeline_mode = #tpu.pipeline_mode<synchronous>, transform_indices = @transform_10, window_bounds = array<i64: 192, 128>}, {pipeline_mode = #tpu.pipeline_mode<synchronous>, transform_indices = @transform_11, window_bounds = array<i64: 1, 1, 128>}, {pipeline_mode = #tpu.pipeline_mode<synchronous>, transform_indices = @transform_12, window_bounds = array<i64: 1, 1, 128>}, {pipeline_mode = #tpu.pipeline_mode<synchronous>, transform_indices = @transform_13, window_bounds = array<i64: 512, 256>}, {pipeline_mode = #tpu.pipeline_mode<synchronous>, transform_indices = @transform_14, window_bounds = array<i64: 1, 256>}, {pipeline_mode = #tpu.pipeline_mode<synchronous>, transform_indices = @transform_15, window_bounds = array<i64: 2, 256>}]} {
    %c0 = arith.constant 0 : index
    %c0_0 = arith.constant 0 : index
    %c0_1 = arith.constant 0 : index
    %0 = vector.load %arg1[%c0, %c0_0, %c0_1] : memref<2x1x64xf32, #tpu.memory_space<vmem>>, vector<2x1x64xf32>
    %1 = vector.extract_strided_slice %0 {offsets = [0, 0, 0], sizes = [1, 1, 64], strides = [1, 1, 1]} : vector<2x1x64xf32> to vector<1x1x64xf32>
    %2 = vector.shape_cast %1 : vector<1x1x64xf32> to vector<1x64xf32>
    %3 = vector.extract_strided_slice %2 {offsets = [0, 0], sizes = [1, 50], strides = [1, 1]} : vector<1x64xf32> to vector<1x50xf32>
    %4 = vector.extract_strided_slice %2 {offsets = [0, 1], sizes = [1, 50], strides = [1, 1]} : vector<1x64xf32> to vector<1x50xf32>
    %5 = vector.extract_strided_slice %2 {offsets = [0, 2], sizes = [1, 50], strides = [1, 1]} : vector<1x64xf32> to vector<1x50xf32>
    %6 = vector.extract_strided_slice %2 {offsets = [0, 3], sizes = [1, 50], strides = [1, 1]} : vector<1x64xf32> to vector<1x50xf32>
    %7 = vector.extract_strided_slice %2 {offsets = [0, 4], sizes = [1, 50], strides = [1, 1]} : vector<1x64xf32> to vector<1x50xf32>
    %8 = vector.extract_strided_slice %2 {offsets = [0, 5], sizes = [1, 50], strides = [1, 1]} : vector<1x64xf32> to vector<1x50xf32>
    %9 = vector.extract_strided_slice %2 {offsets = [0, 6], sizes = [1, 50], strides = [1, 1]} : vector<1x64xf32> to vector<1x50xf32>
    %10 = vector.extract_strided_slice %2 {offsets = [0, 7], sizes = [1, 50], strides = [1, 1]} : vector<1x64xf32> to vector<1x50xf32>
    %11 = vector.extract_strided_slice %2 {offsets = [0, 8], sizes = [1, 50], strides = [1, 1]} : vector<1x64xf32> to vector<1x50xf32>
    %12 = vector.extract_strided_slice %2 {offsets = [0, 9], sizes = [1, 50], strides = [1, 1]} : vector<1x64xf32> to vector<1x50xf32>
    %13 = vector.extract_strided_slice %2 {offsets = [0, 10], sizes = [1, 50], strides = [1, 1]} : vector<1x64xf32> to vector<1x50xf32>
    %14 = vector.extract_strided_slice %2 {offsets = [0, 11], sizes = [1, 50], strides = [1, 1]} : vector<1x64xf32> to vector<1x50xf32>
    %15 = vector.extract_strided_slice %2 {offsets = [0, 12], sizes = [1, 50], strides = [1, 1]} : vector<1x64xf32> to vector<1x50xf32>
    %16 = vector.extract_strided_slice %2 {offsets = [0, 13], sizes = [1, 50], strides = [1, 1]} : vector<1x64xf32> to vector<1x50xf32>
    %17 = vector.extract_strided_slice %2 {offsets = [0, 14], sizes = [1, 50], strides = [1, 1]} : vector<1x64xf32> to vector<1x50xf32>
    %18 = tpu.concatenate %3, %4, %5, %6, %7, %8, %9, %10, %11, %12, %13, %14, %15, %16, %17 in 0 : vector<1x50xf32>, vector<1x50xf32>, vector<1x50xf32>, vector<1x50xf32>, vector<1x50xf32>, vector<1x50xf32>, vector<1x50xf32>, vector<1x50xf32>, vector<1x50xf32>, vector<1x50xf32>, vector<1x50xf32>, vector<1x50xf32>, vector<1x50xf32>, vector<1x50xf32>, vector<1x50xf32> -> vector<15x50xf32>
    %19 = tpu.transpose %18, [1, 0] : vector<15x50xf32> -> vector<50x15xf32>
    %c0_2 = arith.constant 0 : index
    %c0_3 = arith.constant 0 : index
    %20 = vector.load %arg2[%c0_2, %c0_3] : memref<15x16xf32, #tpu.memory_space<vmem>>, vector<15x16xf32>
    %cst = arith.constant dense<0.000000e+00> : vector<50x16xf32>
    %21 = tpu.matmul %19, %20, %cst {dimension_numbers = #tpu.dot_dimension_numbers<[1], [0], [0], [1], [0, 0, 1, 1], [], []>} : vector<50x15xf32>, vector<15x16xf32>, vector<50x16xf32> -> vector<50x16xf32>
    %22 = vector.extract_strided_slice %0 {offsets = [1, 0, 0], sizes = [1, 1, 64], strides = [1, 1, 1]} : vector<2x1x64xf32> to vector<1x1x64xf32>
    %23 = vector.shape_cast %22 : vector<1x1x64xf32> to vector<1x64xf32>
    %24 = vector.extract_strided_slice %23 {offsets = [0, 0], sizes = [1, 50], strides = [1, 1]} : vector<1x64xf32> to vector<1x50xf32>
    %25 = vector.extract_strided_slice %23 {offsets = [0, 1], sizes = [1, 50], strides = [1, 1]} : vector<1x64xf32> to vector<1x50xf32>
    %26 = vector.extract_strided_slice %23 {offsets = [0, 2], sizes = [1, 50], strides = [1, 1]} : vector<1x64xf32> to vector<1x50xf32>
    %27 = vector.extract_strided_slice %23 {offsets = [0, 3], sizes = [1, 50], strides = [1, 1]} : vector<1x64xf32> to vector<1x50xf32>
    %28 = vector.extract_strided_slice %23 {offsets = [0, 4], sizes = [1, 50], strides = [1, 1]} : vector<1x64xf32> to vector<1x50xf32>
    %29 = vector.extract_strided_slice %23 {offsets = [0, 5], sizes = [1, 50], strides = [1, 1]} : vector<1x64xf32> to vector<1x50xf32>
    %30 = vector.extract_strided_slice %23 {offsets = [0, 6], sizes = [1, 50], strides = [1, 1]} : vector<1x64xf32> to vector<1x50xf32>
    %31 = vector.extract_strided_slice %23 {offsets = [0, 7], sizes = [1, 50], strides = [1, 1]} : vector<1x64xf32> to vector<1x50xf32>
    %32 = vector.extract_strided_slice %23 {offsets = [0, 8], sizes = [1, 50], strides = [1, 1]} : vector<1x64xf32> to vector<1x50xf32>
    %33 = vector.extract_strided_slice %23 {offsets = [0, 9], sizes = [1, 50], strides = [1, 1]} : vector<1x64xf32> to vector<1x50xf32>
    %34 = vector.extract_strided_slice %23 {offsets = [0, 10], sizes = [1, 50], strides = [1, 1]} : vector<1x64xf32> to vector<1x50xf32>
    %35 = vector.extract_strided_slice %23 {offsets = [0, 11], sizes = [1, 50], strides = [1, 1]} : vector<1x64xf32> to vector<1x50xf32>
    %36 = vector.extract_strided_slice %23 {offsets = [0, 12], sizes = [1, 50], strides = [1, 1]} : vector<1x64xf32> to vector<1x50xf32>
    %37 = vector.extract_strided_slice %23 {offsets = [0, 13], sizes = [1, 50], strides = [1, 1]} : vector<1x64xf32> to vector<1x50xf32>
    %38 = vector.extract_strided_slice %23 {offsets = [0, 14], sizes = [1, 50], strides = [1, 1]} : vector<1x64xf32> to vector<1x50xf32>
    %39 = tpu.concatenate %24, %25, %26, %27, %28, %29, %30, %31, %32, %33, %34, %35, %36, %37, %38 in 0 : vector<1x50xf32>, vector<1x50xf32>, vector<1x50xf32>, vector<1x50xf32>, vector<1x50xf32>, vector<1x50xf32>, vector<1x50xf32>, vector<1x50xf32>, vector<1x50xf32>, vector<1x50xf32>, vector<1x50xf32>, vector<1x50xf32>, vector<1x50xf32>, vector<1x50xf32>, vector<1x50xf32> -> vector<15x50xf32>
    %40 = tpu.transpose %39, [1, 0] : vector<15x50xf32> -> vector<50x15xf32>
    %c0_4 = arith.constant 0 : index
    %c0_5 = arith.constant 0 : index
    %41 = vector.load %arg2[%c0_4, %c0_5] : memref<15x16xf32, #tpu.memory_space<vmem>>, vector<15x16xf32>
    %cst_6 = arith.constant dense<0.000000e+00> : vector<50x16xf32>
    %42 = tpu.matmul %40, %41, %cst_6 {dimension_numbers = #tpu.dot_dimension_numbers<[1], [0], [0], [1], [0, 0, 1, 1], [], []>} : vector<50x15xf32>, vector<15x16xf32>, vector<50x16xf32> -> vector<50x16xf32>
    %43 = vector.shape_cast %21 : vector<50x16xf32> to vector<1x50x16xf32>
    %44 = vector.shape_cast %42 : vector<50x16xf32> to vector<1x50x16xf32>
    %45 = tpu.concatenate %43, %44 in 0 : vector<1x50x16xf32>, vector<1x50x16xf32> -> vector<2x50x16xf32>
    %c0_7 = arith.constant 0 : index
    %c0_8 = arith.constant 0 : index
    %c0_9 = arith.constant 0 : index
    %46 = vector.load %arg3[%c0_7, %c0_8, %c0_9] : memref<1x1x16xf32, #tpu.memory_space<vmem>>, vector<1x1x16xf32>
    %47 = vector.broadcast %46 : vector<1x1x16xf32> to vector<2x50x16xf32>
    %48 = arith.mulf %45, %47 : vector<2x50x16xf32>
    %c0_10 = arith.constant 0 : index
    %c0_11 = arith.constant 0 : index
    %c0_12 = arith.constant 0 : index
    %49 = vector.load %arg4[%c0_10, %c0_11, %c0_12] : memref<1x1x16xf32, #tpu.memory_space<vmem>>, vector<1x1x16xf32>
    %50 = vector.broadcast %49 : vector<1x1x16xf32> to vector<2x50x16xf32>
    %51 = arith.addf %48, %50 : vector<2x50x16xf32>
    %cst_13 = arith.constant 0.000000e+00 : f32
    %52 = vector.broadcast %cst_13 : f32 to vector<2x50x16xf32>
    %53 = arith.maximumf %51, %52 : vector<2x50x16xf32>
    %54 = vector.extract_strided_slice %53 {offsets = [0, 0, 0], sizes = [2, 48, 16], strides = [1, 1, 1]} : vector<2x50x16xf32> to vector<2x48x16xf32>
    %55 = vector.extract_strided_slice %53 {offsets = [0, 1, 0], sizes = [2, 48, 16], strides = [1, 1, 1]} : vector<2x50x16xf32> to vector<2x48x16xf32>
    %56 = vector.extract_strided_slice %53 {offsets = [0, 2, 0], sizes = [2, 48, 16], strides = [1, 1, 1]} : vector<2x50x16xf32> to vector<2x48x16xf32>
    %57 = tpu.concatenate %54, %55, %56 in 2 : vector<2x48x16xf32>, vector<2x48x16xf32>, vector<2x48x16xf32> -> vector<2x48x48xf32>
    %c0_14 = arith.constant 0 : index
    %c0_15 = arith.constant 0 : index
    %58 = vector.load %arg5[%c0_14, %c0_15] : memref<48x32xf32, #tpu.memory_space<vmem>>, vector<48x32xf32>
    %59 = vector.shape_cast %58 : vector<48x32xf32> to vector<1x48x32xf32>
    %60 = vector.broadcast %59 : vector<1x48x32xf32> to vector<2x48x32xf32>
    "tpu.trace_start"() <{level = 10 : i32, message = "blk,bkc->blc"}> : () -> ()
    %cst_16 = arith.constant dense<0.000000e+00> : vector<2x48x32xf32>
    %61 = tpu.matmul %57, %60, %cst_16 {dimension_numbers = #tpu.dot_dimension_numbers<[2], [1], [1], [2], [0, 0, 0, 1, 1, 2], [0], [0]>} : vector<2x48x48xf32>, vector<2x48x32xf32>, vector<2x48x32xf32> -> vector<2x48x32xf32>
    "tpu.trace_stop"() : () -> ()
    %c0_17 = arith.constant 0 : index
    %c0_18 = arith.constant 0 : index
    %c0_19 = arith.constant 0 : index
    %62 = vector.load %arg6[%c0_17, %c0_18, %c0_19] : memref<1x1x32xf32, #tpu.memory_space<vmem>>, vector<1x1x32xf32>
    %63 = vector.broadcast %62 : vector<1x1x32xf32> to vector<2x48x32xf32>
    %64 = arith.mulf %61, %63 : vector<2x48x32xf32>
    %c0_20 = arith.constant 0 : index
    %c0_21 = arith.constant 0 : index
    %c0_22 = arith.constant 0 : index
    %65 = vector.load %arg7[%c0_20, %c0_21, %c0_22] : memref<1x1x32xf32, #tpu.memory_space<vmem>>, vector<1x1x32xf32>
    %66 = vector.broadcast %65 : vector<1x1x32xf32> to vector<2x48x32xf32>
    %67 = arith.addf %64, %66 : vector<2x48x32xf32>
    %cst_23 = arith.constant 0.000000e+00 : f32
    %68 = vector.broadcast %cst_23 : f32 to vector<2x48x32xf32>
    %69 = arith.maximumf %67, %68 : vector<2x48x32xf32>
    %70 = vector.shape_cast %69 : vector<2x48x32xf32> to vector<96x32xf32>
    %c0_24 = arith.constant 0 : index
    %c0_25 = arith.constant 0 : index
    %71 = vector.load %arg17[%c0_24, %c0_25] : memref<96x32xf32, #tpu.memory_space<vmem>>, vector<96x32xf32>
    tpu.vector_store %arg17[%c0_24, %c0_25], %70 {strides = array<i32>} : memref<96x32xf32, #tpu.memory_space<vmem>>, vector<96x32xf32>,
    %c0_26 = arith.constant 0 : index
    %c0_27 = arith.constant 0 : index
    %72 = tpu.strided_load %arg17[%c0_26, %c0_27] {strides = array<i32: 2, 1>} : memref<96x32xf32, #tpu.memory_space<vmem>>, vector<48x32xf32>
    %c1 = arith.constant 1 : index
    %c0_28 = arith.constant 0 : index
    %73 = tpu.strided_load %arg17[%c1, %c0_28] {strides = array<i32: 2, 1>} : memref<96x32xf32, #tpu.memory_space<vmem>>, vector<48x32xf32>
    %74 = arith.maximumf %72, %73 : vector<48x32xf32>
    %75 = vector.shape_cast %74 : vector<48x32xf32> to vector<2x24x32xf32>
    %76 = vector.extract_strided_slice %75 {offsets = [0, 0, 0], sizes = [2, 22, 32], strides = [1, 1, 1]} : vector<2x24x32xf32> to vector<2x22x32xf32>
    %77 = vector.extract_strided_slice %75 {offsets = [0, 1, 0], sizes = [2, 22, 32], strides = [1, 1, 1]} : vector<2x24x32xf32> to vector<2x22x32xf32>
    %78 = vector.extract_strided_slice %75 {offsets = [0, 2, 0], sizes = [2, 22, 32], strides = [1, 1, 1]} : vector<2x24x32xf32> to vector<2x22x32xf32>
    %79 = tpu.concatenate %76, %77, %78 in 2 : vector<2x22x32xf32>, vector<2x22x32xf32>, vector<2x22x32xf32> -> vector<2x22x96xf32>
    %c0_29 = arith.constant 0 : index
    %c0_30 = arith.constant 0 : index
    %80 = vector.load %arg8[%c0_29, %c0_30] : memref<96x64xf32, #tpu.memory_space<vmem>>, vector<96x64xf32>
    %81 = vector.shape_cast %80 : vector<96x64xf32> to vector<1x96x64xf32>
    %82 = vector.broadcast %81 : vector<1x96x64xf32> to vector<2x96x64xf32>
    "tpu.trace_start"() <{level = 10 : i32, message = "blk,bkc->blc"}> : () -> ()
    %cst_31 = arith.constant dense<0.000000e+00> : vector<2x22x64xf32>
    %83 = tpu.matmul %79, %82, %cst_31 {dimension_numbers = #tpu.dot_dimension_numbers<[2], [1], [1], [2], [0, 0, 0, 1, 1, 2], [0], [0]>} : vector<2x22x96xf32>, vector<2x96x64xf32>, vector<2x22x64xf32> -> vector<2x22x64xf32>
    "tpu.trace_stop"() : () -> ()
    %c0_32 = arith.constant 0 : index
    %c0_33 = arith.constant 0 : index
    %c0_34 = arith.constant 0 : index
    %84 = vector.load %arg9[%c0_32, %c0_33, %c0_34] : memref<1x1x64xf32, #tpu.memory_space<vmem>>, vector<1x1x64xf32>
    %85 = vector.broadcast %84 : vector<1x1x64xf32> to vector<2x22x64xf32>
    %86 = arith.mulf %83, %85 : vector<2x22x64xf32>
    %c0_35 = arith.constant 0 : index
    %c0_36 = arith.constant 0 : index
    %c0_37 = arith.constant 0 : index
    %87 = vector.load %arg10[%c0_35, %c0_36, %c0_37] : memref<1x1x64xf32, #tpu.memory_space<vmem>>, vector<1x1x64xf32>
    %88 = vector.broadcast %87 : vector<1x1x64xf32> to vector<2x22x64xf32>
    %89 = arith.addf %86, %88 : vector<2x22x64xf32>
    %cst_38 = arith.constant 0.000000e+00 : f32
    %90 = vector.broadcast %cst_38 : f32 to vector<2x22x64xf32>
    %91 = arith.maximumf %89, %90 : vector<2x22x64xf32>
    %92 = vector.extract_strided_slice %91 {offsets = [0, 0, 0], sizes = [2, 20, 64], strides = [1, 1, 1]} : vector<2x22x64xf32> to vector<2x20x64xf32>
    %93 = vector.extract_strided_slice %91 {offsets = [0, 1, 0], sizes = [2, 20, 64], strides = [1, 1, 1]} : vector<2x22x64xf32> to vector<2x20x64xf32>
    %94 = vector.extract_strided_slice %91 {offsets = [0, 2, 0], sizes = [2, 20, 64], strides = [1, 1, 1]} : vector<2x22x64xf32> to vector<2x20x64xf32>
    %95 = tpu.concatenate %92, %93, %94 in 2 : vector<2x20x64xf32>, vector<2x20x64xf32>, vector<2x20x64xf32> -> vector<2x20x192xf32>
    %c0_39 = arith.constant 0 : index
    %c0_40 = arith.constant 0 : index
    %96 = vector.load %arg11[%c0_39, %c0_40] : memref<192x128xf32, #tpu.memory_space<vmem>>, vector<192x128xf32>
    %97 = vector.shape_cast %96 : vector<192x128xf32> to vector<1x192x128xf32>
    %98 = vector.broadcast %97 : vector<1x192x128xf32> to vector<2x192x128xf32>
    "tpu.trace_start"() <{level = 10 : i32, message = "blk,bkc->blc"}> : () -> ()
    %cst_41 = arith.constant dense<0.000000e+00> : vector<2x20x128xf32>
    %99 = tpu.matmul %95, %98, %cst_41 {dimension_numbers = #tpu.dot_dimension_numbers<[2], [1], [1], [2], [0, 0, 0, 1, 1, 2], [0], [0]>} : vector<2x20x192xf32>, vector<2x192x128xf32>, vector<2x20x128xf32> -> vector<2x20x128xf32>
    "tpu.trace_stop"() : () -> ()
    %c0_42 = arith.constant 0 : index
    %c0_43 = arith.constant 0 : index
    %c0_44 = arith.constant 0 : index
    %100 = vector.load %arg12[%c0_42, %c0_43, %c0_44] : memref<1x1x128xf32, #tpu.memory_space<vmem>>, vector<1x1x128xf32>
    %101 = vector.broadcast %100 : vector<1x1x128xf32> to vector<2x20x128xf32>
    %102 = arith.mulf %99, %101 : vector<2x20x128xf32>
    %c0_45 = arith.constant 0 : index
    %c0_46 = arith.constant 0 : index
    %c0_47 = arith.constant 0 : index
    %103 = vector.load %arg13[%c0_45, %c0_46, %c0_47] : memref<1x1x128xf32, #tpu.memory_space<vmem>>, vector<1x1x128xf32>
    %104 = vector.broadcast %103 : vector<1x1x128xf32> to vector<2x20x128xf32>
    %105 = arith.addf %102, %104 : vector<2x20x128xf32>
    %cst_48 = arith.constant 0.000000e+00 : f32
    %106 = vector.broadcast %cst_48 : f32 to vector<2x20x128xf32>
    %107 = arith.maximumf %105, %106 : vector<2x20x128xf32>
    %108 = vector.extract_strided_slice %107 {offsets = [0, 0, 0], sizes = [2, 5, 128], strides = [1, 1, 1]} : vector<2x20x128xf32> to vector<2x5x128xf32>
    %cst_49 = arith.constant dense<0xFF800000> : vector<2x128xf32>
    %109 = vector.multi_reduction <maximumf>, %108, %cst_49 [1] : vector<2x5x128xf32> to vector<2x128xf32>
    %110 = vector.shape_cast %109 : vector<2x128xf32> to vector<2x1x128xf32>
    %111 = vector.extract_strided_slice %107 {offsets = [0, 5, 0], sizes = [2, 5, 128], strides = [1, 1, 1]} : vector<2x20x128xf32> to vector<2x5x128xf32>
    %cst_50 = arith.constant dense<0xFF800000> : vector<2x128xf32>
    %112 = vector.multi_reduction <maximumf>, %111, %cst_50 [1] : vector<2x5x128xf32> to vector<2x128xf32>
    %113 = vector.shape_cast %112 : vector<2x128xf32> to vector<2x1x128xf32>
    %114 = vector.extract_strided_slice %107 {offsets = [0, 10, 0], sizes = [2, 5, 128], strides = [1, 1, 1]} : vector<2x20x128xf32> to vector<2x5x128xf32>
    %cst_51 = arith.constant dense<0xFF800000> : vector<2x128xf32>
    %115 = vector.multi_reduction <maximumf>, %114, %cst_51 [1] : vector<2x5x128xf32> to vector<2x128xf32>
    %116 = vector.shape_cast %115 : vector<2x128xf32> to vector<2x1x128xf32>
    %117 = vector.extract_strided_slice %107 {offsets = [0, 15, 0], sizes = [2, 5, 128], strides = [1, 1, 1]} : vector<2x20x128xf32> to vector<2x5x128xf32>
    %cst_52 = arith.constant dense<0xFF800000> : vector<2x128xf32>
    %118 = vector.multi_reduction <maximumf>, %117, %cst_52 [1] : vector<2x5x128xf32> to vector<2x128xf32>
    %119 = vector.shape_cast %118 : vector<2x128xf32> to vector<2x1x128xf32>
    %120 = tpu.concatenate %110, %113, %116, %119 in 2 : vector<2x1x128xf32>, vector<2x1x128xf32>, vector<2x1x128xf32>, vector<2x1x128xf32> -> vector<2x1x512xf32>
    %121 = vector.shape_cast %120 : vector<2x1x512xf32> to vector<2x512xf32>
    %c0_53 = arith.constant 0 : index
    %c0_54 = arith.constant 0 : index
    %122 = vector.load %arg14[%c0_53, %c0_54] : memref<512x256xf32, #tpu.memory_space<vmem>>, vector<512x256xf32>
    %cst_55 = arith.constant dense<0.000000e+00> : vector<2x256xf32>
    %123 = tpu.matmul %121, %122, %cst_55 {dimension_numbers = #tpu.dot_dimension_numbers<[1], [0], [0], [1], [0, 0, 1, 1], [], []>} : vector<2x512xf32>, vector<512x256xf32>, vector<2x256xf32> -> vector<2x256xf32>
    %c0_56 = arith.constant 0 : index
    %c0_57 = arith.constant 0 : index
    %124 = vector.load %arg15[%c0_56, %c0_57] : memref<1x256xf32, #tpu.memory_space<vmem>>, vector<1x256xf32>
    %125 = vector.broadcast %124 : vector<1x256xf32> to vector<2x256xf32>
    %126 = arith.addf %123, %125 : vector<2x256xf32>
    %cst_58 = arith.constant 0.000000e+00 : f32
    %127 = vector.broadcast %cst_58 : f32 to vector<2x256xf32>
    %128 = arith.maximumf %126, %127 : vector<2x256xf32>
    %c0_59 = arith.constant 0 : index
    %c0_60 = arith.constant 0 : index
    %129 = vector.load %arg16[%c0_59, %c0_60] : memref<2x256xf32, #tpu.memory_space<vmem>>, vector<2x256xf32>
    tpu.vector_store %arg16[%c0_59, %c0_60], %128 {strides = array<i32>} : memref<2x256xf32, #tpu.memory_space<vmem>>, vector<2x256xf32>,
    return
  }
  func.func @transform_0(%arg0: i32) -> (i32, i32, i32) {
    %c0_i32 = arith.constant 0 : i32
    %c0_i32_0 = arith.constant 0 : i32
    %c0_i32_1 = arith.constant 0 : i32
    %c0_i32_2 = arith.constant 0 : i32
    return %c0_i32, %c0_i32_0, %c0_i32_1 : i32, i32, i32
  }
  func.func @transform_1(%arg0: i32) -> (i32, i32) {
    %c0_i32 = arith.constant 0 : i32
    %c0_i32_0 = arith.constant 0 : i32
    %c0_i32_1 = arith.constant 0 : i32
    return %c0_i32, %c0_i32_0 : i32, i32
  }
  func.func @transform_2(%arg0: i32) -> (i32, i32, i32) {
    %c0_i32 = arith.constant 0 : i32
    %c0_i32_0 = arith.constant 0 : i32
    %c0_i32_1 = arith.constant 0 : i32
    %c0_i32_2 = arith.constant 0 : i32
    return %c0_i32, %c0_i32_0, %c0_i32_1 : i32, i32, i32
  }
  func.func @transform_3(%arg0: i32) -> (i32, i32, i32) {
    %c0_i32 = arith.constant 0 : i32
    %c0_i32_0 = arith.constant 0 : i32
    %c0_i32_1 = arith.constant 0 : i32
    %c0_i32_2 = arith.constant 0 : i32
    return %c0_i32, %c0_i32_0, %c0_i32_1 : i32, i32, i32
  }
  func.func @transform_4(%arg0: i32) -> (i32, i32) {
    %c0_i32 = arith.constant 0 : i32
    %c0_i32_0 = arith.constant 0 : i32
    %c0_i32_1 = arith.constant 0 : i32
    return %c0_i32, %c0_i32_0 : i32, i32
  }
  func.func @transform_5(%arg0: i32) -> (i32, i32, i32) {
    %c0_i32 = arith.constant 0 : i32
    %c0_i32_0 = arith.constant 0 : i32
    %c0_i32_1 = arith.constant 0 : i32
    %c0_i32_2 = arith.constant 0 : i32
    return %c0_i32, %c0_i32_0, %c0_i32_1 : i32, i32, i32
  }
  func.func @transform_6(%arg0: i32) -> (i32, i32, i32) {
    %c0_i32 = arith.constant 0 : i32
    %c0_i32_0 = arith.constant 0 : i32
    %c0_i32_1 = arith.constant 0 : i32
    %c0_i32_2 = arith.constant 0 : i32
    return %c0_i32, %c0_i32_0, %c0_i32_1 : i32, i32, i32
  }
  func.func @transform_7(%arg0: i32) -> (i32, i32) {
    %c0_i32 = arith.constant 0 : i32
    %c0_i32_0 = arith.constant 0 : i32
    %c0_i32_1 = arith.constant 0 : i32
    return %c0_i32, %c0_i32_0 : i32, i32
  }
  func.func @transform_8(%arg0: i32) -> (i32, i32, i32) {
    %c0_i32 = arith.constant 0 : i32
    %c0_i32_0 = arith.constant 0 : i32
    %c0_i32_1 = arith.constant 0 : i32
    %c0_i32_2 = arith.constant 0 : i32
    return %c0_i32, %c0_i32_0, %c0_i32_1 : i32, i32, i32
  }
  func.func @transform_9(%arg0: i32) -> (i32, i32, i32) {
    %c0_i32 = arith.constant 0 : i32
    %c0_i32_0 = arith.constant 0 : i32
    %c0_i32_1 = arith.constant 0 : i32
    %c0_i32_2 = arith.constant 0 : i32
    return %c0_i32, %c0_i32_0, %c0_i32_1 : i32, i32, i32
  }
  func.func @transform_10(%arg0: i32) -> (i32, i32) {
    %c0_i32 = arith.constant 0 : i32
    %c0_i32_0 = arith.constant 0 : i32
    %c0_i32_1 = arith.constant 0 : i32
    return %c0_i32, %c0_i32_0 : i32, i32
  }
  func.func @transform_11(%arg0: i32) -> (i32, i32, i32) {
    %c0_i32 = arith.constant 0 : i32
    %c0_i32_0 = arith.constant 0 : i32
    %c0_i32_1 = arith.constant 0 : i32
    %c0_i32_2 = arith.constant 0 : i32
    return %c0_i32, %c0_i32_0, %c0_i32_1 : i32, i32, i32
  }
  func.func @transform_12(%arg0: i32) -> (i32, i32, i32) {
    %c0_i32 = arith.constant 0 : i32
    %c0_i32_0 = arith.constant 0 : i32
    %c0_i32_1 = arith.constant 0 : i32
    %c0_i32_2 = arith.constant 0 : i32
    return %c0_i32, %c0_i32_0, %c0_i32_1 : i32, i32, i32
  }
  func.func @transform_13(%arg0: i32) -> (i32, i32) {
    %c0_i32 = arith.constant 0 : i32
    %c0_i32_0 = arith.constant 0 : i32
    %c0_i32_1 = arith.constant 0 : i32
    return %c0_i32, %c0_i32_0 : i32, i32
  }
  func.func @transform_14(%arg0: i32) -> (i32, i32) {
    %c0_i32 = arith.constant 0 : i32
    %c0_i32_0 = arith.constant 0 : i32
    %c0_i32_1 = arith.constant 0 : i32
    return %c0_i32, %c0_i32_0 : i32, i32
  }
  func.func @transform_15(%arg0: i32) -> (i32, i32) {
    %c0_i32 = arith.constant 0 : i32
    %c0_i32_0 = arith.constant 0 : i32
    %c0_i32_1 = arith.constant 0 : i32
    return %c0_i32, %c0_i32_0 : i32, i32
  }
}

</mosaic_0001>

<bundles_post_ra>
// kernel: tpu_custom_call.1
= control target key start
LH: loop header
LB: loop body
LE: loop exit
PB: predicated region body
PF: predicated region fallthrough
CT: control target
= control target key end

     0   :  { %20 = vsyncpa [#allocation4], 0  ;;  %s3428_s0 = inlined_call_operand.vmem [shape: f32[2,1,64], index: 0, kind: input, shape index: {}]   ;;  %s3429_s1 = inlined_call_operand.vmem [shape: f32[15,16], index: 1, kind: input, shape index: {}]   ;;  %s3430_s2 = inlined_call_operand.vmem [shape: f32[1,1,16], index: 2, kind: input, shape index: {}]   ;;  %s3431_s3 = inlined_call_operand.vmem [shape: f32[1,1,16], index: 3, kind: input, shape index: {}]   ;;  %s3432_s4 = inlined_call_operand.vmem [shape: f32[48,32], index: 4, kind: input, shape index: {}]   ;;  %s3433_s5 = inlined_call_operand.vmem [shape: f32[1,1,32], index: 5, kind: input, shape index: {}]   ;;  %s3434_s6 = inlined_call_operand.vmem [shape: f32[1,1,32], index: 6, kind: input, shape index: {}]   ;;  %s3435_s7 = inlined_call_operand.vmem [shape: f32[96,64], index: 7, kind: input, shape index: {}]   ;;  %s3436_s8 = inlined_call_operand.vmem [shape: f32[1,1,64], index: 8, kind: input, shape index: {}]   ;;  %s3437_s9 = inlined_call_operand.vmem [shape: f32[1,1,64], index: 9, kind: input, shape index: {}]   ;;  %s3438_s10 = inlined_call_operand.vmem [shape: f32[192,128], index: 10, kind: input, shape index: {}]   ;;  %s3439_s11 = inlined_call_operand.vmem [shape: f32[1,1,128], index: 11, kind: input, shape index: {}]   ;;  %s3440_s12 = inlined_call_operand.vmem [shape: f32[1,1,128], index: 12, kind: input, shape index: {}]   ;;  %s3441_s13 = inlined_call_operand.hbm [shape: f32[512,256], index: 13, kind: input, shape index: {}]   ;;  %s3442_s14 = inlined_call_operand.vmem [shape: f32[1,256], index: 14, kind: input, shape index: {}]   ;;  %s3443_s15 = inlined_call_operand.hbm [shape: f32[2,256], index: 15, kind: output, shape index: {}]  }
   0x1   :  { %21 = vsyncpa [#allocation5], 0  ;;  %s2648_s18 = smov [#allocation3]   ;;  %s2600_s22 = scalar_lea.hbm %s3441_s13, 16384 }
   0x2   :  { %s53_s19 = sshll.u32 %s2648_s18, 4  ;;  %p2601_p0 = scmp.ne.s32.totalorder %s3441_s13, %s2600_s22  ;;  %s54_s19 = int_to_ptr.vmem [resolvable:$true] %s53_s19 }
   0x3   :  { %p2604_p1 = scmp.lt.u32.totalorder %s2600_s22, %s3441_s13 }
   0x5   :  { %p2606_p2 = pnand %p2604_p1, %p2601_p0 }
   0x7   :  { %2609 = shalt.err (!%p2606_p2)
}
   0x8   :  { %s2610_s27 = scalar_lea.vmem %s54_s19, 16384  ;;  %p2615_p4 = scmp.lt.s32.totalorder %s54_s19, %s54_s19 }
   0x9   :  { %p2611_p3 = scmp.ne.s32.totalorder %s54_s19, %s2610_s27  ;;  %p2616_p5 = scmp.lt.s32.totalorder %s2610_s27, %s2610_s27 }
   0xb   :  { %p2617_p6 = por %p2616_p5, %p2615_p4 }
   0xd   :  { %p2618_p7 = pnand %p2617_p6, %p2611_p3 }
   0xf   :  { %2621 = shalt.err (!%p2618_p7)
}
  0x10   :  { %s2649_s28 = smov 256   ;;  %s2650_s29 = smov 16  }
  0x11   :  { %59 = dma.hbm_to_vmem [thread:$0]  %s3441_s13, 16384, %s54_s19, [#allocation4], %s2649_s28, %s2649_s28, %s2650_s29  }
  0x12   :  { %2644 = dma.done.wait [#allocation4], 16384  }
  0x13   :  { %2645 = vsyncadd [#allocation4], 4294950912  ;;  %v68_v0 = vlaneseq  ;;  %v2773_v3 = vld [vmem:[%s3428_s0 + $0x1] sm:$0x1]  ;;  %v2778_v4 = vld [vmem:[%s3428_s0] sm:$0x1] }
  0x14   :  { %s2651_s13 = smov 127   ;;  %s2652_s19 = smov 126   ;;  %vm126_vm0 = vcmask 1046528   ;;  %v166_v7 = vld [vmem:[%s3429_s1] sm:$0xff]  ;;  %v167_v8 = vld [vmem:[%s3429_s1 + $0x8] sm:$0x7f] }
  0x15   :  { %v2765_v1 = vshrl.u32 %v68_v0, 7  ;;  %s2653_s22 = smov 125   ;;  %s2654_s23 = smov 124   ;;  %v2663_v9 = vmov 0.0|0.0   ;;  %v2305_v10 = vpack.c.bf16 %v167_v8, %v166_v7  ;;  %vm2664_vm1 = vmmov 1  }
  0x16   :  { %s2655_s24 = smov 120   ;;  %s2656_s0 = smov 119   ;;  %2308 = vmatprep.subr.bf16.mxu1 %v2663_v9  ;;  %vm2306_vm2 = vmpackc.low %vm126_vm0, %vm2664_vm1  ;;  %2304 = vmatprep.subr.bf16.mxu0 %v2663_v9  ;;  %vm2665_vm3 = vmmov 0   ;;  %v2666_v11 = vmov 0.0   ;;  %vm114_vm4 = vcmask 1040384   ;;  %vm116_vm5 = vcmask 1041408  }
  0x17   :  { %v2768_v2 = vsub.s32 0, %v2765_v1  ;;  %s2657_s25 = smov 123   ;;  %s2658_s26 = smov 118   ;;  %2175 = vmatprep.mubr.msk.f32.mxu1 %vm2665_vm3, %v2666_v11  ;;  %2150 = vmatprep.mubr.msk.f32.mxu0 %vm2665_vm3, %v2666_v11  ;;  %vm118_vm6 = vcmask 1042432   ;;  %vm120_vm7 = vcmask 1043456   ;;  %vm122_vm8 = vcmask 1044480  }
  0x18   :  { %s2659_s27 = smov 122   ;;  %s2660_s28 = smov 117   ;;  %2311 = vmatpush3.bf16.msk.msra.mxu1 %vm2306_vm2, %v2305_v10  ;;  %2307 = vmatpush3.bf16.msk.msra.mxu0 %vm2306_vm2, %v2305_v10  ;;  %vm124_vm9 = vcmask 1045504   ;;  %vm168_vm10 = vcmask 121856   ;;  %vm700_vm11 = vcmask 130048   ;;  %vm713_vm12 = vcmask 261120  }
  0x19   :  { %v297_v5 = vrot.slane %v2773_v3, %v2768_v2  ;;  %v71_v6 = vrot.slane %v2778_v4, %v2768_v2  ;;  %s2661_s30 = smov 121   ;;  %s2662_s16 = smov 116   ;;  %vm732_vm13 = vcmask 392192   ;;  %vm1118_vm14 = vcmask 523264  }
  0x1a   :  { %s2668_s1 = smov 114   ;;  %vm1137_vm15 = vcmask 785408   ;;  %vm1659_vm1 = vcmask 1046530   ;;  %vm1674_vm2 = vcmask 1047559  }
  0x1b   :  { %298 = vrot.lane.b32.xlu0 %v297_v5, %s2651_s13  ;;  %72 = vrot.lane.b32.xlu1 %v71_v6, %s2651_s13  ;;  %s2667_s13 = smov 115  }
  0x1f   :  { %301 = vrot.lane.b32.xlu0 %v297_v5, %s2652_s19  ;;  %304 = vrot.lane.b32.xlu1 %v297_v5, %s2653_s22 }
  0x23   :  { %75 = vrot.lane.b32.xlu0 %v71_v6, %s2652_s19  ;;  %307 = vrot.lane.b32.xlu1 %v297_v5, %s2654_s23 }
  0x27   :  { %319 = vrot.lane.b32.xlu0 %v297_v5, %s2655_s24  ;;  %322 = vrot.lane.b32.xlu1 %v297_v5, %s2656_s0 }
  0x2b   :  { %78 = vrot.lane.b32.xlu0 %v71_v6, %s2653_s22  ;;  %310 = vrot.lane.b32.xlu1 %v297_v5, %s2657_s25 }
  0x2f   :  { %325 = vrot.lane.b32.xlu0 %v297_v5, %s2658_s26  ;;  %81 = vrot.lane.b32.xlu1 %v71_v6, %s2654_s23 }
  0x33   :  { %93 = vrot.lane.b32.xlu0 %v71_v6, %s2655_s24  ;;  %96 = vrot.lane.b32.xlu1 %v71_v6, %s2656_s0 }
  0x37   :  { %313 = vrot.lane.b32.xlu0 %v297_v5, %s2659_s27  ;;  %328 = vrot.lane.b32.xlu1 %v297_v5, %s2660_s28 }
  0x3b   :  { %84 = vrot.lane.b32.xlu0 %v71_v6, %s2657_s25  ;;  %99 = vrot.lane.b32.xlu1 %v71_v6, %s2658_s26 }
  0x3f   :  { %316 = vrot.lane.b32.xlu0 %v297_v5, %s2661_s30  ;;  %331 = vrot.lane.b32.xlu1 %v297_v5, %s2662_s16 }
  0x43   :  { %87 = vrot.lane.b32.xlu0 %v71_v6, %s2659_s27  ;;  %102 = vrot.lane.b32.xlu1 %v71_v6, %s2660_s28  ;;  %s2671_s27 = smov [#allocation6]  }
  0x47   :  { %334 = vrot.lane.b32.xlu0 %v297_v5, %s2667_s13  ;;  %90 = vrot.lane.b32.xlu1 %v71_v6, %s2661_s30 }
  0x4b   :  { %105 = vrot.lane.b32.xlu0 %v71_v6, %s2662_s16  ;;  %337 = vrot.lane.b32.xlu1 %v297_v5, %s2668_s1 }
  0x4f   :  { %108 = vrot.lane.b32.xlu0 %v71_v6, %s2667_s13  ;;  %111 = vrot.lane.b32.xlu1 %v71_v6, %s2668_s1 }
  0x8d   :  { %v299_v12 = vpop.permute.xlu0 %298  ;;  %v73_v13 = vpop.permute.xlu1 %72 }
  0x8e   :  { %v340_v28 = vsel %vm114_vm4, %v2773_v3, %v299_v12  ;;  %v115_v39 = vsel %vm114_vm4, %v2778_v4, %v73_v13 }
  0x91   :  { %v302_v14 = vpop.permute.xlu0 %301  ;;  %v305_v15 = vpop.permute.xlu1 %304 }
  0x92   :  { %v341_v29 = vsel %vm116_vm5, %v340_v28, %v302_v14 }
  0x93   :  { %v342_v32 = vsel %vm118_vm6, %v341_v29, %v305_v15  ;;  %v728_v29 = vld [vmem:[%s3432_s4 + $0x10] sm:$0xff] }
  0x95   :  { %v76_v16 = vpop.permute.xlu0 %75  ;;  %v308_v17 = vpop.permute.xlu1 %307 }
  0x96   :  { %v343_v33 = vsel %vm120_vm7, %v342_v32, %v308_v17  ;;  %v117_v40 = vsel %vm116_vm5, %v115_v39, %v76_v16 }
  0x99   :  { %v320_v18 = vpop.permute.xlu0 %319  ;;  %v323_v19 = vpop.permute.xlu1 %322 }
  0x9a   :  { %v347_v46 = vsel %vm114_vm4, %v320_v18, %v323_v19 }
  0x9d   :  { %v79_v20 = vpop.permute.xlu0 %78  ;;  %v311_v21 = vpop.permute.xlu1 %310 }
  0x9e   :  { %v344_v34 = vsel %vm122_vm8, %v343_v33, %v311_v21  ;;  %v119_v43 = vsel %vm118_vm6, %v117_v40, %v79_v20  ;;  %v2866_v20 = vld [vmem:[%s3430_s2] ss:$0 sm:$0xff]  ;;  %s2016_s2 = sshll.u32 %s2671_s27, 4  ;;  %s2017_s2 = int_to_ptr.vmem [resolvable:$true] %s2016_s2 }
  0x9f   :  { %v726_v21 = vld [vmem:[%s3432_s4] sm:$0xff]  ;;  %p2627_p9 = scmp.lt.s32.totalorder %s2017_s2, %s2017_s2 }
  0xa0   :  { %v730_v40 = vld [vmem:[%s3432_s4 + $0x20] sm:$0xff] }
  0xa1   :  { %v326_v22 = vpop.permute.xlu0 %325  ;;  %v82_v23 = vpop.permute.xlu1 %81 }
  0xa2   :  { %v121_v44 = vsel %vm120_vm7, %v119_v43, %v82_v23  ;;  %v348_v50 = vsel %vm116_vm5, %v347_v46, %v326_v22  ;;  %v727_v22 = vld [vmem:[%s3432_s4 + $0x8] sm:$0xff] }
  0xa5   :  { %v94_v24 = vpop.permute.xlu0 %93  ;;  %v97_v25 = vpop.permute.xlu1 %96 }
  0xa6   :  { %v128_v57 = vsel %vm114_vm4, %v94_v24, %v97_v25  ;;  %v2877_v24 = vld [vmem:[%s3431_s3] ss:$0 sm:$0xff]  ;;  %v2312_v25 = vpack.c.bf16 %v727_v22, %v726_v21 }
  0xa8   :  { %2325 = vmatprep.subr.bf16.mxu1 %v2312_v25  ;;  %2313 = vmatprep.subr.bf16.mxu0 %v2312_v25 }
  0xa9   :  { %v314_v26 = vpop.permute.xlu0 %313  ;;  %v329_v27 = vpop.permute.xlu1 %328 }
  0xaa   :  { %v345_v35 = vsel %vm124_vm9, %v344_v34, %v314_v26  ;;  %v349_v52 = vsel %vm118_vm6, %v348_v50, %v329_v27 }
  0xad   :  { %v85_v30 = vpop.permute.xlu0 %84  ;;  %v100_v31 = vpop.permute.xlu1 %99 }
  0xae   :  { %v123_v45 = vsel %vm122_vm8, %v121_v44, %v85_v30  ;;  %v129_v59 = vsel %vm116_vm5, %v128_v57, %v100_v31  ;;  %v729_v30 = vld [vmem:[%s3432_s4 + $0x18] sm:$0xff] }
  0xaf   :  { %v2316_v32 = vpack.c.bf16 %v729_v30, %v728_v29 }
  0xb1   :  { %v317_v36 = vpop.permute.xlu0 %316  ;;  %v332_v37 = vpop.permute.xlu1 %331 }
  0xb2   :  { %v346_v38 = vsel %vm126_vm0, %v345_v35, %v317_v36  ;;  %v350_v53 = vsel %vm120_vm7, %v349_v52, %v332_v37 }
  0xb3   :  { %353 = vxpose.xlu0.b32.start [1/2] (short) (narrow) %v346_v38, 56 }
  0xb5   :  { %v88_v41 = vpop.permute.xlu0 %87  ;;  %v103_v42 = vpop.permute.xlu1 %102 }
  0xb6   :  { %v125_v47 = vsel %vm124_vm9, %v123_v45, %v88_v41  ;;  %v130_v60 = vsel %vm118_vm6, %v129_v59, %v103_v42  ;;  %v731_v41 = vld [vmem:[%s3432_s4 + $0x28] sm:$0xff]  ;;  %s2669_s4 = smov 32  }
  0xb7   :  { %v2320_v44 = vpack.c.bf16 %v731_v41, %v730_v40 }
  0xb9   :  { %v335_v48 = vpop.permute.xlu0 %334  ;;  %v91_v49 = vpop.permute.xlu1 %90 }
  0xba   :  { %v127_v51 = vsel %vm126_vm0, %v125_v47, %v91_v49  ;;  %v351_v54 = vsel %vm122_vm8, %v350_v53, %v335_v48 }
  0xbb   :  { %134 = vxpose.xlu1.b32.start [1/2] (short) (narrow) %v127_v51, 56 }
  0xbd   :  { %v106_v55 = vpop.permute.xlu0 %105  ;;  %v338_v56 = vpop.permute.xlu1 %337 }
  0xbe   :  { %v352_v58 = vsel %vm124_vm9, %v351_v54, %v338_v56  ;;  %v131_v61 = vsel %vm120_vm7, %v130_v60, %v106_v55 }
  0xbf   :  { %354 = vxpose.xlu0.b32.end [2/2] (short) (narrow) %v352_v58, 56 }
  0xc1   :  { %v109_v62 = vpop.permute.xlu0 %108  ;;  %v112_v63 = vpop.permute.xlu1 %111 }
  0xc2   :  { %v132_v0 = vsel %vm122_vm8, %v131_v61, %v109_v62 }
  0xc3   :  { %v133_v3 = vsel %vm124_vm9, %v132_v0, %v112_v63 }
  0xc4   :  { %135 = vxpose.xlu1.b32.end [2/2] (short) (narrow) %v133_v3, 56 }
 0x13b   :  { %v369_v4 = vpop.trf.xlu0 }
 0x13c   :  { %2176 = vmatmul.mubr.msk.f32.vlgmr.msra.gmra.mrb[0].mxu1 %vm168_vm10, %v369_v4 }
 0x13d   :  { %2178 = vmatprep.mubr.msk.f32.mxu1 %vm2665_vm3, %v2666_v11  ;;  %2327 = vmatpush3.bf16.msra.mxu1 %v2312_v25 }
 0x13e   :  { %2329 = vmatprep.subr.bf16.mxu1 %v2316_v32 }
 0x13f   :  { %v370_v5 = vpop.trf.xlu0 }
 0x140   :  { %2179 = vmatmul.mubr.msk.f32.gmra.mrb[2].mxu1 %vm168_vm10, %v370_v5  ;;  %v150_v6 = vpop.trf.xlu1 }
 0x141   :  { %2151 = vmatmul.mubr.msk.f32.vlgmr.msra.gmra.mrb[0].mxu0 %vm168_vm10, %v150_v6  ;;  %2181 = vmatprep.mubr.msk.f32.mxu1 %vm2665_vm3, %v2666_v11 }
 0x142   :  { %2153 = vmatprep.mubr.msk.f32.mxu0 %vm2665_vm3, %v2666_v11  ;;  %2315 = vmatpush3.bf16.msra.mxu0 %v2312_v25 }
 0x143   :  { %v371_v7 = vpop.trf.xlu0  ;;  %2317 = vmatprep.subr.bf16.mxu0 %v2316_v32  ;;  %2331 = vmatpush3.bf16.msra.mxu1 %v2316_v32 }
 0x144   :  { %2182 = vmatmul.mubr.msk.f32.gmra.mrb[4].mxu1 %vm168_vm10, %v371_v7  ;;  %v151_v8 = vpop.trf.xlu1  ;;  %2333 = vmatprep.subr.bf16.mxu1 %v2320_v44 }
 0x145   :  { %2154 = vmatmul.mubr.msk.f32.gmra.mrb[2].mxu0 %vm168_vm10, %v151_v8  ;;  %2184 = vmatprep.mubr.msk.f32.mxu1 %vm2665_vm3, %v2666_v11 }
 0x146   :  { %2156 = vmatprep.mubr.msk.f32.mxu0 %vm2665_vm3, %v2666_v11  ;;  %2319 = vmatpush3.bf16.msra.mxu0 %v2316_v32 }
 0x147   :  { %v372_v10 = vpop.trf.xlu0  ;;  %2321 = vmatprep.subr.bf16.mxu0 %v2320_v44  ;;  %2335 = vmatpush3.bf16.msra.mxu1 %v2320_v44 }
 0x148   :  { %v152_v12 = vpop.trf.xlu1  ;;  %2185 = vmatmul.mubr.msk.f32.gmra.mrb[6].mxu1 %vm168_vm10, %v372_v10  ;;  %2354 = vmatprep.subr.bf16.mxu1 %v2663_v9 }
 0x149   :  { %2157 = vmatmul.mubr.msk.f32.gmra.mrb[4].mxu0 %vm168_vm10, %v152_v12  ;;  %2187 = vmatprep.mubr.msk.f32.mxu1 %vm2665_vm3, %v2666_v11 }
 0x14a   :  { %2159 = vmatprep.mubr.msk.f32.mxu0 %vm2665_vm3, %v2666_v11  ;;  %2323 = vmatpush3.bf16.msra.mxu0 %v2320_v44 }
 0x14b   :  { %v373_v13 = vpop.trf.xlu0  ;;  %2336 = vmatprep.subr.bf16.mxu0 %v2663_v9 }
 0x14c   :  { %v153_v14 = vpop.trf.xlu1  ;;  %2188 = vmatmul.mubr.msk.f32.gmra.mrb[8].mxu1 %vm168_vm10, %v373_v13 }
 0x14d   :  { %2160 = vmatmul.mubr.msk.f32.gmra.mrb[6].mxu0 %vm168_vm10, %v153_v14  ;;  %2190 = vmatprep.mubr.msk.f32.mxu1 %vm2665_vm3, %v2666_v11 }
 0x14e   :  { %2162 = vmatprep.mubr.msk.f32.mxu0 %vm2665_vm3, %v2666_v11 }
 0x14f   :  { %v374_v15 = vpop.trf.xlu0 }
 0x150   :  { %v154_v16 = vpop.trf.xlu1  ;;  %2191 = vmatmul.mubr.msk.f32.gmra.mrb[10].mxu1 %vm168_vm10, %v374_v15 }
 0x151   :  { %2163 = vmatmul.mubr.msk.f32.gmra.mrb[8].mxu0 %vm168_vm10, %v154_v16  ;;  %2193 = vmatprep.mubr.msk.f32.mxu1 %vm2665_vm3, %v2666_v11 }
 0x152   :  { %2165 = vmatprep.mubr.msk.f32.mxu0 %vm2665_vm3, %v2666_v11 }
 0x153   :  { %v375_v17 = vpop.trf.xlu0 }
 0x154   :  { %v155_v18 = vpop.trf.xlu1  ;;  %2194 = vmatmul.mubr.msk.f32.gmra.mrb[12].mxu1 %vm168_vm10, %v375_v17 }
 0x155   :  { %2166 = vmatmul.mubr.msk.f32.gmra.mrb[10].mxu0 %vm168_vm10, %v155_v18 }
 0x156   :  { %2168 = vmatprep.mubr.msk.f32.mxu0 %vm2665_vm3, %v2666_v11 }
 0x158   :  { %v156_v19 = vpop.trf.xlu1 }
 0x159   :  { %2169 = vmatmul.mubr.msk.f32.gmra.mrb[12].mxu0 %vm168_vm10, %v156_v19 }
 0x20f   :  { %v472_v23 = vpop.f32.mrb[0].mxu1 }
 0x210   :  { %v520_v26 = vmul.f32 %v2866_v20, %v472_v23  ;;  %v2177_v27 = vpop.f32.mrb[1].mxu1 }
 0x212   :  { %v541_v28 = vadd.f32 %v2877_v24, %v520_v26 }
 0x213   :  { %v477_v31 = vpop.f32.mrb[2].mxu1 }
 0x214   :  { %v521_v33 = vmul.f32 %v2866_v20, %v477_v31  ;;  %v259_v34 = vpop.f32.mrb[0].mxu0  ;;  %v2180_v35 = vpop.f32.mrb[3].mxu1  ;;  %v2889_v38 = vmax.f32 %v541_v28, 0.0 }
 0x215   :  { %v513_v36 = vmul.f32 %v2866_v20, %v259_v34  ;;  %v2152_v37 = vpop.f32.mrb[1].mxu0 }
 0x216   :  { %v542_v39 = vadd.f32 %v2877_v24, %v521_v33  ;;  %v589_v52 = vrot.slane %v2889_v38, 1  ;;  %v651_v4 = vrot.slane %v2889_v38, 2 }
 0x217   :  { %v534_v42 = vadd.f32 %v2877_v24, %v513_v36  ;;  %v482_v43 = vpop.f32.mrb[4].mxu1 }
 0x218   :  { %v2899_v45 = vmax.f32 %v542_v39, 0.0  ;;  %v522_v46 = vmul.f32 %v2866_v20, %v482_v43  ;;  %v264_v47 = vpop.f32.mrb[2].mxu0  ;;  %v2183_v48 = vpop.f32.mrb[5].mxu1 }
 0x219   :  { %v514_v49 = vmul.f32 %v2866_v20, %v264_v47  ;;  %v2155_v50 = vpop.f32.mrb[3].mxu0  ;;  %v2906_v54 = vmax.f32 %v534_v42, 0.0 }
 0x21a   :  { %v543_v51 = vadd.f32 %v2877_v24, %v522_v46  ;;  %v590_v53 = vrot.slane %v2899_v45, 1  ;;  %v652_v60 = vrot.slane %v2899_v45, 2 }
 0x21b   :  { %v535_v55 = vadd.f32 %v2877_v24, %v514_v49  ;;  %v487_v56 = vpop.f32.mrb[6].mxu1  ;;  %v576_v6 = vrot.slane %v2906_v54, 1  ;;  %v638_v22 = vrot.slane %v2906_v54, 2 }
 0x21c   :  { %v269_v57 = vpop.f32.mrb[4].mxu0  ;;  %v523_v58 = vmul.f32 %v2866_v20, %v487_v56  ;;  %v591_v59 = vsel %vm126_vm0, %v589_v52, %v590_v53  ;;  %v2186_v61 = vpop.f32.mrb[7].mxu1  ;;  %v2914_v62 = vmax.f32 %v543_v51, 0.0  ;;  %v653_v13 = vsel %vm124_vm9, %v651_v4, %v652_v60 }
 0x21d   :  { %v2916_v63 = vmax.f32 %v535_v55, 0.0  ;;  %v515_v0 = vmul.f32 %v2866_v20, %v269_v57  ;;  %614 = vrot.lane.b32.xlu0 %v591_v59, %s2650_s29  ;;  %v2158_v3 = vpop.f32.mrb[5].mxu0 }
 0x21e   :  { %v544_v10 = vadd.f32 %v2877_v24, %v523_v58  ;;  %v592_v19 = vrot.slane %v2914_v62, 1  ;;  %v654_v28 = vrot.slane %v2914_v62, 2 }
 0x21f   :  { %v536_v5 = vadd.f32 %v2877_v24, %v515_v0  ;;  %v577_v7 = vrot.slane %v2916_v63, 1  ;;  %v492_v8 = vpop.f32.mrb[8].mxu1  ;;  %v639_v14 = vrot.slane %v2916_v63, 2 }
 0x220   :  { %v274_v12 = vpop.f32.mrb[6].mxu0  ;;  %v2189_v15 = vpop.f32.mrb[9].mxu1  ;;  %v524_v25 = vmul.f32 %v2866_v20, %v492_v8  ;;  %v2938_v30 = vmax.f32 %v544_v10, 0.0  ;;  %v593_v32 = vsel %vm126_vm0, %v590_v53, %v592_v19  ;;  %v655_v37 = vsel %vm124_vm9, %v652_v60, %v654_v28 }
 0x221   :  { %v2927_v16 = vmax.f32 %v536_v5, 0.0  ;;  %v516_v17 = vmul.f32 %v2866_v20, %v274_v12  ;;  %676 = vrot.lane.b32.xlu0 %v653_v13, %s2669_s4  ;;  %v578_v18 = vsel %vm126_vm0, %v576_v6, %v577_v7  ;;  %v2161_v21 = vpop.f32.mrb[7].mxu0  ;;  %v640_v26 = vsel %vm124_vm9, %v638_v22, %v639_v14 }
 0x222   :  { %602 = vrot.lane.b32.xlu1 %v578_v18, %s2650_s29  ;;  %v545_v36 = vadd.f32 %v2877_v24, %v524_v25  ;;  %v594_v46 = vrot.slane %v2938_v30, 1  ;;  %v656_v50 = vrot.slane %v2938_v30, 2 }
 0x223   :  { %v497_v23 = vpop.f32.mrb[10].mxu1  ;;  %v537_v31 = vadd.f32 %v2877_v24, %v516_v17  ;;  %v579_v33 = vrot.slane %v2927_v16, 1  ;;  %v641_v39 = vrot.slane %v2927_v16, 2 }
 0x224   :  { %v279_v27 = vpop.f32.mrb[8].mxu0  ;;  %v2192_v29 = vpop.f32.mrb[11].mxu1  ;;  %v525_v48 = vmul.f32 %v2866_v20, %v497_v23  ;;  %v2958_v52 = vmax.f32 %v545_v36, 0.0  ;;  %v595_v55 = vsel %vm126_vm0, %v592_v19, %v594_v46  ;;  %v657_v59 = vsel %vm124_vm9, %v654_v28, %v656_v50 }
 0x225   :  { %664 = vrot.lane.b32.xlu0 %v640_v26, %s2669_s4  ;;  %v2164_v34 = vpop.f32.mrb[9].mxu0  ;;  %v2948_v42 = vmax.f32 %v537_v31, 0.0  ;;  %v517_v43 = vmul.f32 %v2866_v20, %v279_v27  ;;  %v580_v44 = vsel %vm126_vm0, %v577_v7, %v579_v33  ;;  %v642_v49 = vsel %vm124_vm9, %v639_v14, %v641_v39 }
 0x226   :  { %616 = vrot.lane.b32.xlu1 %v593_v32, %s2650_s29  ;;  %v546_v58 = vadd.f32 %v2877_v24, %v525_v48  ;;  %v596_v4 = vrot.slane %v2958_v52, 1  ;;  %v658_v7 = vrot.slane %v2958_v52, 2 }
 0x227   :  { %v502_v35 = vpop.f32.mrb[12].mxu1  ;;  %v538_v53 = vadd.f32 %v2877_v24, %v517_v43  ;;  %v581_v56 = vrot.slane %v2948_v42, 1  ;;  %v643_v60 = vrot.slane %v2948_v42, 2 }
 0x228   :  { %v284_v40 = vpop.f32.mrb[10].mxu0  ;;  %v2195_v41 = vpop.f32.mrb[13].mxu1  ;;  %v526_v5 = vmul.f32 %v2866_v20, %v502_v35  ;;  %v2978_v8 = vmax.f32 %v546_v58, 0.0  ;;  %v597_v12 = vsel %vm126_vm0, %v594_v46, %v596_v4  ;;  %v659_v15 = vsel %vm124_vm9, %v656_v50, %v658_v7 }
 0x229   :  { %678 = vrot.lane.b32.xlu0 %v655_v37, %s2669_s4  ;;  %v2167_v47 = vpop.f32.mrb[11].mxu0  ;;  %v2968_v61 = vmax.f32 %v538_v53, 0.0  ;;  %v518_v0 = vmul.f32 %v2866_v20, %v284_v40  ;;  %v582_v3 = vsel %vm126_vm0, %v579_v33, %v581_v56  ;;  %v644_v6 = vsel %vm124_vm9, %v641_v39, %v643_v60 }
 0x22a   :  { %604 = vrot.lane.b32.xlu1 %v580_v44, %s2650_s29  ;;  %v547_v14 = vadd.f32 %v2877_v24, %v526_v5  ;;  %v598_v22 = vrot.slane %v2978_v8, 1  ;;  %v660_v26 = vrot.slane %v2978_v8, 2 }
 0x22b   :  { %v539_v10 = vadd.f32 %v2877_v24, %v518_v0  ;;  %v583_v13 = vrot.slane %v2968_v61, 1  ;;  %v645_v17 = vrot.slane %v2968_v61, 2 }
 0x22c   :  { %v289_v51 = vpop.f32.mrb[12].mxu0  ;;  %v561_v23 = vmax.f32 %v547_v14, 0.0  ;;  %v599_v28 = vsel %vm126_vm0, %v596_v4, %v598_v22  ;;  %v661_v31 = vsel %vm124_vm9, %v658_v7, %v660_v26 }
 0x22d   :  { %666 = vrot.lane.b32.xlu0 %v642_v49, %s2669_s4  ;;  %v2170_v57 = vpop.f32.mrb[13].mxu0  ;;  %v2988_v18 = vmax.f32 %v539_v10, 0.0  ;;  %v519_v19 = vmul.f32 %v2866_v20, %v289_v51  ;;  %v584_v21 = vsel %vm126_vm0, %v581_v56, %v583_v13  ;;  %v646_v25 = vsel %vm124_vm9, %v643_v60, %v645_v17 }
 0x22e   :  { %618 = vrot.lane.b32.xlu1 %v595_v55, %s2650_s29  ;;  %v662_v29 = vrot.slane %v561_v23, 2  ;;  %v600_v34 = vrot.slane %v561_v23, 1 }
 0x22f   :  { %v540_v27 = vadd.f32 %v2877_v24, %v519_v19  ;;  %v585_v20 = vrot.slane %v2988_v18, 1  ;;  %v647_v35 = vrot.slane %v2988_v18, 2 }
 0x230   :  { %v663_v24 = vsel %vm124_vm9, %v660_v26, %v662_v29  ;;  %v601_v36 = vsel %vm126_vm0, %v598_v22, %v600_v34 }
 0x231   :  { %680 = vrot.lane.b32.xlu0 %v657_v59, %s2669_s4  ;;  %v554_v32 = vmax.f32 %v540_v27, 0.0  ;;  %v586_v33 = vsel %vm126_vm0, %v583_v13, %v585_v20  ;;  %v648_v39 = vsel %vm124_vm9, %v645_v17, %v647_v35 }
 0x232   :  { %606 = vrot.lane.b32.xlu1 %v582_v3, %s2650_s29 }
 0x233   :  { %v587_v37 = vrot.slane %v554_v32, 1  ;;  %v649_v40 = vrot.slane %v554_v32, 2 }
 0x235   :  { %668 = vrot.lane.b32.xlu0 %v644_v6, %s2669_s4  ;;  %v588_v41 = vsel %vm126_vm0, %v585_v20, %v587_v37  ;;  %v650_v43 = vsel %vm124_vm9, %v647_v35, %v649_v40  ;;  %v1130_v37 = vld [vmem:[%s3435_s7 + $0x28] sm:$0xff]  ;;  %v1131_v40 = vld [vmem:[%s3435_s7 + $0x30] sm:$0xff] }
 0x236   :  { %620 = vrot.lane.b32.xlu1 %v597_v12, %s2650_s29 }
 0x239   :  { %682 = vrot.lane.b32.xlu0 %v659_v15, %s2669_s4 }
 0x23a   :  { %608 = vrot.lane.b32.xlu1 %v584_v21, %s2650_s29 }
 0x23d   :  { %670 = vrot.lane.b32.xlu0 %v646_v25, %s2669_s4 }
 0x23e   :  { %622 = vrot.lane.b32.xlu1 %v599_v28, %s2650_s29 }
 0x241   :  { %684 = vrot.lane.b32.xlu0 %v661_v31, %s2669_s4 }
 0x242   :  { %610 = vrot.lane.b32.xlu1 %v586_v33, %s2650_s29  ;;  %v1126_v33 = vld [vmem:[%s3435_s7 + $0x8] sm:$0xff] }
 0x245   :  { %686 = vrot.lane.b32.xlu0 %v663_v24, %s2669_s4  ;;  %v1128_v24 = vld [vmem:[%s3435_s7 + $0x18] sm:$0xff] }
 0x246   :  { %624 = vrot.lane.b32.xlu1 %v601_v36, %s2650_s29  ;;  %v1129_v36 = vld [vmem:[%s3435_s7 + $0x20] sm:$0xff] }
 0x249   :  { %672 = vrot.lane.b32.xlu0 %v648_v39, %s2669_s4  ;;  %v2343_v39 = vpack.c.bf16 %v1130_v37, %v1129_v36 }
 0x24a   :  { %612 = vrot.lane.b32.xlu1 %v588_v41, %s2650_s29  ;;  %v1132_v41 = vld [vmem:[%s3435_s7 + $0x38] sm:$0xff] }
 0x24e   :  { %674 = vrot.lane.b32.xlu1 %v650_v43, %s2669_s4  ;;  %v2346_v43 = vpack.c.bf16 %v1132_v41, %v1131_v40 }
 0x28f   :  { %v615_v44 = vpop.permute.xlu0 %614 }
 0x290   :  { %v707_v46 = vsel %vm700_vm11, %v2889_v38, %v615_v44  ;;  %v1133_v44 = vld [vmem:[%s3435_s7 + $0x40] sm:$0xff] }
 0x293   :  { %v677_v47 = vpop.permute.xlu0 %676 }
 0x294   :  { %v720_v48 = vsel %vm713_vm12, %v707_v46, %v677_v47  ;;  %v603_v49 = vpop.permute.xlu1 %602  ;;  %v1134_v46 = vld [vmem:[%s3435_s7 + $0x48] sm:$0xff] }
 0x295   :  { %2229 = vmatprep.mubr.msk.f32.mxu1 %vm732_vm13, %v720_v48  ;;  %v701_v50 = vsel %vm700_vm11, %v2906_v54, %v603_v49  ;;  %v2349_v47 = vpack.c.bf16 %v1134_v46, %v1133_v44  ;;  %v1135_v48 = vld [vmem:[%s3435_s7 + $0x50] sm:$0xff]  ;;  %v1136_v49 = vld [vmem:[%s3435_s7 + $0x58] sm:$0xff] }
 0x297   :  { %v665_v51 = vpop.permute.xlu0 %664 }
 0x298   :  { %v714_v53 = vsel %vm713_vm12, %v701_v50, %v665_v51  ;;  %v617_v55 = vpop.permute.xlu1 %616  ;;  %v2352_v50 = vpack.c.bf16 %v1136_v49, %v1135_v48  ;;  %v3120_v51 = vld [vmem:[%s3433_s5] ss:$0 sm:$0xff]  ;;  %s2670_s5 = smov 64  }
 0x299   :  { %2208 = vmatprep.mubr.msk.f32.mxu0 %vm732_vm13, %v714_v53  ;;  %v708_v56 = vsel %vm700_vm11, %v2899_v45, %v617_v55  ;;  %v3125_v55 = vld [vmem:[%s3434_s6] ss:$0 sm:$0xff] }
 0x29b   :  { %v679_v57 = vpop.permute.xlu0 %678 }
 0x29c   :  { %v721_v38 = vsel %vm713_vm12, %v708_v56, %v679_v57  ;;  %v605_v58 = vpop.permute.xlu1 %604 }
 0x29d   :  { %2230 = vmatmul.mubr.msk.f32.vlgmr.msra.gmra.mrb[14].mxu1 %vm732_vm13, %v721_v38  ;;  %v702_v59 = vsel %vm700_vm11, %v2916_v63, %v605_v58 }
 0x29f   :  { %v667_v60 = vpop.permute.xlu0 %666 }
 0x2a0   :  { %v715_v54 = vsel %vm713_vm12, %v702_v59, %v667_v60  ;;  %v619_v0 = vpop.permute.xlu1 %618 }
 0x2a1   :  { %2209 = vmatmul.mubr.msk.f32.vlgmr.msra.gmra.mrb[14].mxu0 %vm732_vm13, %v715_v54  ;;  %v709_v3 = vsel %vm700_vm11, %v2914_v62, %v619_v0 }
 0x2a3   :  { %v681_v4 = vpop.permute.xlu0 %680 }
 0x2a4   :  { %v722_v45 = vsel %vm713_vm12, %v709_v3, %v681_v4  ;;  %v607_v5 = vpop.permute.xlu1 %606 }
 0x2a5   :  { %2232 = vmatprep.mubr.msk.f32.mxu1 %vm732_vm13, %v722_v45  ;;  %v703_v6 = vsel %vm700_vm11, %v2927_v16, %v607_v5 }
 0x2a7   :  { %v669_v7 = vpop.permute.xlu0 %668 }
 0x2a8   :  { %v716_v63 = vsel %vm713_vm12, %v703_v6, %v669_v7  ;;  %v621_v10 = vpop.permute.xlu1 %620 }
 0x2a9   :  { %2211 = vmatprep.mubr.msk.f32.mxu0 %vm732_vm13, %v716_v63  ;;  %v710_v12 = vsel %vm700_vm11, %v2938_v30, %v621_v10 }
 0x2ab   :  { %v683_v13 = vpop.permute.xlu0 %682 }
 0x2ac   :  { %v723_v62 = vsel %vm713_vm12, %v710_v12, %v683_v13  ;;  %v609_v14 = vpop.permute.xlu1 %608 }
 0x2ad   :  { %2233 = vmatmul.mubr.msk.f32.gmra.mrb[16].mxu1 %vm732_vm13, %v723_v62  ;;  %v704_v15 = vsel %vm700_vm11, %v2948_v42, %v609_v14 }
 0x2af   :  { %v671_v17 = vpop.permute.xlu0 %670 }
 0x2b0   :  { %v717_v16 = vsel %vm713_vm12, %v704_v15, %v671_v17  ;;  %v623_v19 = vpop.permute.xlu1 %622 }
 0x2b1   :  { %2212 = vmatmul.mubr.msk.f32.gmra.mrb[16].mxu0 %vm732_vm13, %v717_v16  ;;  %v711_v21 = vsel %vm700_vm11, %v2958_v52, %v623_v19 }
 0x2b3   :  { %v685_v22 = vpop.permute.xlu0 %684 }
 0x2b4   :  { %v724_v30 = vsel %vm713_vm12, %v711_v21, %v685_v22  ;;  %v611_v23 = vpop.permute.xlu1 %610 }
 0x2b5   :  { %2235 = vmatprep.mubr.msk.f32.mxu1 %vm732_vm13, %v724_v30  ;;  %v705_v28 = vsel %vm700_vm11, %v2968_v61, %v611_v23  ;;  %v1125_v61 = vld [vmem:[%s3435_s7] sm:$0xff] }
 0x2b6   :  { %v2337_v34 = vpack.c.bf16 %v1126_v33, %v1125_v61 }
 0x2b7   :  { %v687_v25 = vpop.permute.xlu0 %686 }
 0x2b8   :  { %v625_v26 = vpop.permute.xlu1 %624  ;;  %2356 = vmatpush3.bf16.msra.mxu1 %v2337_v34  ;;  %2338 = vmatpush3.bf16.msra.mxu0 %v2337_v34 }
 0x2b9   :  { %v712_v42 = vsel %vm700_vm11, %v2978_v8, %v625_v26  ;;  %2357 = vmatprep.subr.bf16.mxu1 %v2663_v9  ;;  %2339 = vmatprep.subr.bf16.mxu0 %v2663_v9 }
 0x2ba   :  { %v725_v27 = vsel %vm713_vm12, %v712_v42, %v687_v25 }
 0x2bb   :  { %v673_v20 = vpop.permute.xlu0 %672  ;;  %2236 = vmatmul.mubr.msk.f32.gmra.mrb[18].mxu1 %vm732_vm13, %v725_v27 }
 0x2bc   :  { %v718_v52 = vsel %vm713_vm12, %v705_v28, %v673_v20  ;;  %v613_v29 = vpop.permute.xlu1 %612  ;;  %2295 = vmatprep.mubr.msk.f32.mxu1 %vm2665_vm3, %v2666_v11 }
 0x2bd   :  { %2214 = vmatprep.mubr.msk.f32.mxu0 %vm732_vm13, %v718_v52  ;;  %v706_v31 = vsel %vm700_vm11, %v2988_v18, %v613_v29  ;;  %v1127_v18 = vld [vmem:[%s3435_s7 + $0x10] sm:$0xff] }
 0x2be   :  { %v2340_v35 = vpack.c.bf16 %v1128_v24, %v1127_v18 }
 0x2c0   :  { %v675_v8 = vpop.permute.xlu1 %674  ;;  %2359 = vmatpush3.bf16.msra.mxu1 %v2340_v35  ;;  %2341 = vmatpush3.bf16.msra.mxu0 %v2340_v35 }
 0x2c1   :  { %v719_v32 = vsel %vm713_vm12, %v706_v31, %v675_v8  ;;  %2360 = vmatprep.subr.bf16.mxu1 %v2663_v9  ;;  %2342 = vmatprep.subr.bf16.mxu0 %v2663_v9 }
 0x2c2   :  { %2215 = vmatmul.mubr.msk.f32.gmra.mrb[18].mxu0 %vm732_vm13, %v719_v32 }
 0x2c3   :  { %2262 = vmatprep.mubr.msk.f32.mxu0 %vm2665_vm3, %v2666_v11 }
 0x2c4   :  { %2362 = vmatpush3.bf16.msra.mxu1 %v2343_v39  ;;  %2344 = vmatpush3.bf16.msra.mxu0 %v2343_v39 }
 0x2c5   :  { %2363 = vmatprep.subr.bf16.mxu1 %v2663_v9  ;;  %2345 = vmatprep.subr.bf16.mxu0 %v2663_v9 }
 0x2c8   :  { %2365 = vmatpush3.bf16.msra.mxu1 %v2346_v43  ;;  %2347 = vmatpush3.bf16.msra.mxu0 %v2346_v43 }
 0x2c9   :  { %2366 = vmatprep.subr.bf16.mxu1 %v2663_v9  ;;  %2348 = vmatprep.subr.bf16.mxu0 %v2663_v9 }
 0x2cc   :  { %2368 = vmatpush3.bf16.msra.mxu1 %v2349_v47  ;;  %2350 = vmatpush3.bf16.msra.mxu0 %v2349_v47 }
 0x2cd   :  { %2369 = vmatprep.subr.bf16.mxu1 %v2663_v9  ;;  %2351 = vmatprep.subr.bf16.mxu0 %v2663_v9 }
 0x2d0   :  { %2371 = vmatpush3.bf16.msra.mxu1 %v2352_v50  ;;  %2353 = vmatpush3.bf16.msra.mxu0 %v2352_v50 }
 0x2d1   :  { %2408 = vmatprep.subr.bf16.mxu1 %v2663_v9  ;;  %2372 = vmatprep.subr.bf16.mxu0 %v2663_v9 }
 0x370   :  { %v2231_v53 = vpop.f32.mrb[14].mxu1 }
 0x371   :  { %v973_v56 = vmul.f32 %v2231_v53, %v3120_v51  ;;  %v930_v57 = vpop.f32.mrb[15].mxu1 }
 0x372   :  { %v972_v38 = vmul.f32 %v3120_v51, %v930_v57 }
 0x373   :  { %v992_v58 = vadd.f32 %v3125_v55, %v973_v56 }
 0x374   :  { %v991_v59 = vadd.f32 %v3125_v55, %v972_v38  ;;  %v2210_v60 = vpop.f32.mrb[14].mxu0 }
 0x375   :  { %v1004_v54 = vmax.f32 %v992_v58, 0.0  ;;  %v967_v0 = vmul.f32 %v2210_v60, %v3120_v51  ;;  %v817_v3 = vpop.f32.mrb[15].mxu0 }
 0x376   :  { %v1003_v4 = vmax.f32 %v991_v59, 0.0  ;;  %v966_v45 = vmul.f32 %v3120_v51, %v817_v3 }
 0x377   :  { %1016 = vst.msk [vmem:[#allocation2 + $0x38] sm:$0xff] %vm713_vm12, %v1004_v54  ;;  %v986_v5 = vadd.f32 %v3125_v55, %v967_v0 }
 0x378   :  { %1015 = vst.msk [vmem:[#allocation2 + $0x30] sm:$0xff] %vm713_vm12, %v1003_v4  ;;  %v985_v6 = vadd.f32 %v3125_v55, %v966_v45 }
 0x379   :  { %v998_v7 = vmax.f32 %v986_v5, 0.0 }
 0x37a   :  { %v997_v63 = vmax.f32 %v985_v6, 0.0 }
 0x37b   :  { %1010 = vst.msk [vmem:[#allocation2 + $0x8] sm:$0xff] %vm713_vm12, %v998_v7 }
 0x37c   :  { %1009 = vst.msk [vmem:[#allocation2] sm:$0xff] %vm713_vm12, %v997_v63 }
 0x37f   :  { %v1027_v27 = vld [vmem:[#allocation2 + $0x30] ss:$2 sm:$0xff]  ;;  %v1039_v28 = vld [vmem:[#allocation2 + $0x31] ss:$2 sm:$0xff] }
 0x380   :  { %v2234_v10 = vpop.f32.mrb[16].mxu1  ;;  %v3151_v20 = vmax.f32 %v1027_v27, %v1039_v28 }
 0x381   :  { %v975_v12 = vmul.f32 %v2234_v10, %v3120_v51  ;;  %v940_v13 = vpop.f32.mrb[17].mxu1 }
 0x382   :  { %v974_v62 = vmul.f32 %v3120_v51, %v940_v13  ;;  %v1089_v35 = vrot.slane %v3151_v20, 2  ;;  %v1061_v40 = vrot.slane %v3151_v20, 1 }
 0x383   :  { %v994_v14 = vadd.f32 %v3125_v55, %v975_v12  ;;  %v1021_v29 = vld [vmem:[#allocation2] ss:$2 sm:$0xff]  ;;  %v1033_v31 = vld [vmem:[#allocation2 + $0x1] ss:$2 sm:$0xff] }
 0x384   :  { %v993_v15 = vadd.f32 %v3125_v55, %v974_v62  ;;  %v2213_v17 = vpop.f32.mrb[16].mxu0  ;;  %v3159_v36 = vmax.f32 %v1021_v29, %v1033_v31 }
 0x385   :  { %v1006_v16 = vmax.f32 %v994_v14, 0.0  ;;  %v969_v19 = vmul.f32 %v2213_v17, %v3120_v51  ;;  %v827_v21 = vpop.f32.mrb[17].mxu0 }
 0x386   :  { %v1005_v22 = vmax.f32 %v993_v15, 0.0  ;;  %v968_v30 = vmul.f32 %v3120_v51, %v827_v21  ;;  %v1084_v56 = vrot.slane %v3159_v36, 2  ;;  %v1056_v59 = vrot.slane %v3159_v36, 1 }
 0x387   :  { %1018 = vst.msk [vmem:[#allocation2 + $0x48] sm:$0xff] %vm713_vm12, %v1006_v16  ;;  %v988_v23 = vadd.f32 %v3125_v55, %v969_v19 }
 0x388   :  { %1017 = vst.msk [vmem:[#allocation2 + $0x40] sm:$0xff] %vm713_vm12, %v1005_v22  ;;  %v987_v25 = vadd.f32 %v3125_v55, %v968_v30 }
 0x389   :  { %v1000_v26 = vmax.f32 %v988_v23, 0.0 }
 0x38a   :  { %v999_v42 = vmax.f32 %v987_v25, 0.0 }
 0x38b   :  { %1012 = vst.msk [vmem:[#allocation2 + $0x18] sm:$0xff] %vm713_vm12, %v1000_v26 }
 0x38c   :  { %1011 = vst.msk [vmem:[#allocation2 + $0x10] sm:$0xff] %vm713_vm12, %v999_v42 }
 0x38e   :  { %v2237_v52 = vpop.f32.mrb[18].mxu1 }
 0x38f   :  { %v977_v8 = vmul.f32 %v2237_v52, %v3120_v51  ;;  %v950_v32 = vpop.f32.mrb[19].mxu1  ;;  %v1029_v61 = vld [vmem:[#allocation2 + $0x40] ss:$2 sm:$0xff]  ;;  %v1041_v33 = vld [vmem:[#allocation2 + $0x41] ss:$2 sm:$0xff] }
 0x390   :  { %v976_v18 = vmul.f32 %v3120_v51, %v950_v32  ;;  %v3155_v34 = vmax.f32 %v1029_v61, %v1041_v33 }
 0x391   :  { %v996_v24 = vadd.f32 %v3125_v55, %v977_v8 }
 0x392   :  { %v995_v37 = vadd.f32 %v3125_v55, %v976_v18  ;;  %v1090_v39 = vrot.slane %v3155_v34, 2  ;;  %v1062_v41 = vrot.slane %v3155_v34, 1 }
 0x393   :  { %v1008_v43 = vmax.f32 %v996_v24, 0.0  ;;  %v1023_v44 = vld [vmem:[#allocation2 + $0x10] ss:$2 sm:$0xff]  ;;  %v1035_v46 = vld [vmem:[#allocation2 + $0x11] ss:$2 sm:$0xff] }
 0x394   :  { %v1007_v47 = vmax.f32 %v995_v37, 0.0  ;;  %v1091_v48 = vsel %vm124_vm9, %v1089_v35, %v1090_v39  ;;  %v1063_v49 = vsel %vm126_vm0, %v1061_v40, %v1062_v41  ;;  %v3167_v50 = vmax.f32 %v1023_v44, %v1035_v46  ;;  %v1400_v44 = vld [vmem:[%s3438_s10 + $0x10] sm:$0xff] }
 0x395   :  { %1020 = vst.msk [vmem:[#allocation2 + $0x58] sm:$0xff] %vm713_vm12, %v1008_v43  ;;  %1100 = vrot.lane.b32.xlu1 %v1091_v48, %s2670_s5  ;;  %1072 = vrot.lane.b32.xlu0 %v1063_v49, %s2669_s4  ;;  %v2216_v53 = vpop.f32.mrb[18].mxu0  ;;  %v1399_v43 = vld [vmem:[%s3438_s10 + $0x8] sm:$0xff]  ;;  %v1402_v48 = vld [vmem:[%s3438_s10 + $0x20] sm:$0xff] }
 0x396   :  { %1019 = vst.msk [vmem:[#allocation2 + $0x50] sm:$0xff] %vm713_vm12, %v1007_v47  ;;  %v971_v57 = vmul.f32 %v2216_v53, %v3120_v51  ;;  %v837_v38 = vpop.f32.mrb[19].mxu0  ;;  %v1085_v58 = vrot.slane %v3167_v50, 2  ;;  %v1057_v60 = vrot.slane %v3167_v50, 1  ;;  %v1403_v49 = vld [vmem:[%s3438_s10 + $0x28] sm:$0xff]  ;;  %v1404_v53 = vld [vmem:[%s3438_s10 + $0x30] sm:$0xff] }
 0x397   :  { %v970_v54 = vmul.f32 %v3120_v51, %v837_v38  ;;  %v1406_v38 = vld [vmem:[%s3438_s10 + $0x40] sm:$0xff] }
 0x398   :  { %v990_v0 = vadd.f32 %v3125_v55, %v971_v57  ;;  %v1086_v3 = vsel %vm124_vm9, %v1084_v56, %v1085_v58  ;;  %v1058_v4 = vsel %vm126_vm0, %v1056_v59, %v1057_v60  ;;  %v1405_v56 = vld [vmem:[%s3438_s10 + $0x38] sm:$0xff] }
 0x399   :  { %v989_v45 = vadd.f32 %v3125_v55, %v970_v54  ;;  %1094 = vrot.lane.b32.xlu1 %v1086_v3, %s2670_s5  ;;  %1066 = vrot.lane.b32.xlu0 %v1058_v4, %s2669_s4  ;;  %v2382_v57 = vpack.c.bf16 %v1405_v56, %v1404_v53  ;;  %v1409_v54 = vld [vmem:[%s3438_s10 + $0x58] sm:$0xff]  ;;  %v1410_v3 = vld [vmem:[%s3438_s10 + $0x60] sm:$0xff] }
 0x39a   :  { %v1002_v5 = vmax.f32 %v990_v0, 0.0  ;;  %v1411_v4 = vld [vmem:[%s3438_s10 + $0x68] sm:$0xff] }
 0x39b   :  { %v1001_v6 = vmax.f32 %v989_v45, 0.0  ;;  %v2391_v45 = vpack.c.bf16 %v1411_v4, %v1410_v3 }
 0x39c   :  { %1014 = vst.msk [vmem:[#allocation2 + $0x28] sm:$0xff] %vm713_vm12, %v1002_v5  ;;  %v1412_v5 = vld [vmem:[%s3438_s10 + $0x70] sm:$0xff] }
 0x39d   :  { %1013 = vst.msk [vmem:[#allocation2 + $0x20] sm:$0xff] %vm713_vm12, %v1001_v6  ;;  %v1031_v7 = vld [vmem:[#allocation2 + $0x50] ss:$2 sm:$0xff]  ;;  %v1043_v51 = vld [vmem:[#allocation2 + $0x51] ss:$2 sm:$0xff] }
 0x39e   :  { %v1049_v63 = vmax.f32 %v1031_v7, %v1043_v51  ;;  %v1413_v6 = vld [vmem:[%s3438_s10 + $0x78] sm:$0xff]  ;;  %v1414_v51 = vld [vmem:[%s3438_s10 + $0x80] sm:$0xff] }
 0x39f   :  { %v2394_v7 = vpack.c.bf16 %v1413_v6, %v1412_v5  ;;  %v1758_v6 = vld [vmem:[#allocation3 + $0x208] sm:$0xff] }
 0x3a0   :  { %v1092_v10 = vrot.slane %v1049_v63, 2  ;;  %v1064_v12 = vrot.slane %v1049_v63, 1 }
 0x3a2   :  { %1104 = vrot.lane.b32.xlu1 %v1092_v10, %s2670_s5  ;;  %1076 = vrot.lane.b32.xlu0 %v1064_v12, %s2669_s4  ;;  %v1093_v62 = vsel %vm124_vm9, %v1090_v39, %v1092_v10  ;;  %v1065_v14 = vsel %vm126_vm0, %v1062_v41, %v1064_v12  ;;  %v1398_v41 = vld [vmem:[%s3438_s10] sm:$0xff]  ;;  %v1416_v12 = vld [vmem:[%s3438_s10 + $0x90] sm:$0xff] }
 0x3a3   :  { %v2373_v46 = vpack.c.bf16 %v1399_v43, %v1398_v41 }
 0x3a4   :  { %v1025_v55 = vld [vmem:[#allocation2 + $0x20] ss:$2 sm:$0xff]  ;;  %v1037_v13 = vld [vmem:[#allocation2 + $0x21] ss:$2 sm:$0xff] }
 0x3a5   :  { %v1046_v15 = vmax.f32 %v1025_v55, %v1037_v13  ;;  %v1417_v55 = vld [vmem:[%s3438_s10 + $0x98] sm:$0xff] }
 0x3a6   :  { %1102 = vrot.lane.b32.xlu1 %v1093_v62, %s2670_s5  ;;  %1074 = vrot.lane.b32.xlu0 %v1065_v14, %s2669_s4  ;;  %v2400_v13 = vpack.c.bf16 %v1417_v55, %v1416_v12  ;;  %v1418_v62 = vld [vmem:[%s3438_s10 + $0xa0] sm:$0xff]  ;;  %v1419_v14 = vld [vmem:[%s3438_s10 + $0xa8] sm:$0xff] }
 0x3a7   :  { %v1087_v17 = vrot.slane %v1046_v15, 2  ;;  %v1059_v16 = vrot.slane %v1046_v15, 1  ;;  %v1693_v55 = vld [vmem:[#allocation3] sm:$0xff] }
 0x3a9   :  { %v1088_v19 = vsel %vm124_vm9, %v1085_v58, %v1087_v17  ;;  %v1060_v21 = vsel %vm126_vm0, %v1057_v60, %v1059_v16  ;;  %v1407_v58 = vld [vmem:[%s3438_s10 + $0x48] sm:$0xff]  ;;  %v1408_v60 = vld [vmem:[%s3438_s10 + $0x50] sm:$0xff] }
 0x3aa   :  { %1096 = vrot.lane.b32.xlu1 %v1088_v19, %s2670_s5  ;;  %1068 = vrot.lane.b32.xlu0 %v1060_v21, %s2669_s4  ;;  %v2385_v59 = vpack.c.bf16 %v1407_v58, %v1406_v38  ;;  %v2388_v0 = vpack.c.bf16 %v1409_v54, %v1408_v60  ;;  %v1696_v60 = vld [vmem:[#allocation3 + $0x18] sm:$0xff] }
 0x3ae   :  { %1098 = vrot.lane.b32.xlu1 %v1087_v17, %s2670_s5  ;;  %1070 = vrot.lane.b32.xlu0 %v1059_v16, %s2669_s4  ;;  %v1420_v17 = vld [vmem:[%s3438_s10 + $0xb0] sm:$0xff]  ;;  %v1421_v16 = vld [vmem:[%s3438_s10 + $0xb8] sm:$0xff] }
 0x3af   :  { %v2406_v19 = vpack.c.bf16 %v1421_v16, %v1420_v17 }
 0x407   :  { %v1073_v22 = vpop.permute.xlu0 %1072  ;;  %v1101_v30 = vpop.permute.xlu1 %1100 }
 0x408   :  { %v1115_v23 = vsel %vm713_vm12, %v3151_v20, %v1073_v22 }
 0x409   :  { %v1122_v25 = vsel %vm1118_vm14, %v1115_v23, %v1101_v30 }
 0x40a   :  { %2296 = vmatmul.mubr.msk.f32.vlgmr.msra.gmra.mrb[20].mxu1 %vm1137_vm15, %v1122_v25  ;;  %v2063_v25 = vld [vmem:[%s3436_s8] ss:$0 sm:$0xff] }
 0x40b   :  { %v1067_v26 = vpop.permute.xlu0 %1066  ;;  %v1095_v42 = vpop.permute.xlu1 %1094  ;;  %2298 = vmatprep.mubr.msk.f32.mxu1 %vm2665_vm3, %v2666_v11  ;;  %2410 = vmatpush1.bf16.msra.mxu1 %v2373_v46 }
 0x40c   :  { %v1112_v27 = vsel %vm713_vm12, %v3159_v36, %v1067_v26  ;;  %2411 = vmatprep.subr.bf16.mxu1 %v2663_v9 }
 0x40d   :  { %v1119_v28 = vsel %vm1118_vm14, %v1112_v27, %v1095_v42  ;;  %v2064_v42 = vld [vmem:[%s3437_s9] ss:$0 sm:$0xff] }
 0x40e   :  { %2263 = vmatmul.mubr.msk.f32.vlgmr.msra.gmra.mrb[20].mxu0 %vm1137_vm15, %v1119_v28 }
 0x40f   :  { %2265 = vmatprep.mubr.msk.f32.mxu0 %vm2665_vm3, %v2666_v11  ;;  %2374 = vmatpush1.bf16.msra.mxu0 %v2373_v46 }
 0x410   :  { %2375 = vmatprep.subr.bf16.mxu0 %v2663_v9 }
 0x414   :  { %v1077_v20 = vpop.permute.xlu0 %1076  ;;  %v1105_v52 = vpop.permute.xlu1 %1104 }
 0x415   :  { %v1117_v61 = vsel %vm713_vm12, %v1049_v63, %v1077_v20  ;;  %v1415_v63 = vld [vmem:[%s3438_s10 + $0x88] sm:$0xff] }
 0x416   :  { %v1124_v35 = vsel %vm1118_vm14, %v1117_v61, %v1105_v52  ;;  %v2397_v10 = vpack.c.bf16 %v1415_v63, %v1414_v51 }
 0x418   :  { %v1075_v29 = vpop.permute.xlu0 %1074  ;;  %v1103_v31 = vpop.permute.xlu1 %1102 }
 0x419   :  { %v1116_v8 = vsel %vm713_vm12, %v3155_v34, %v1075_v29 }
 0x41a   :  { %v1123_v32 = vsel %vm1118_vm14, %v1116_v8, %v1103_v31 }
 0x41b   :  { %2299 = vmatmul.mubr.msk.f32.gmra.mrb[22].mxu1 %vm1137_vm15, %v1123_v32 }
 0x41c   :  { %v1069_v33 = vpop.permute.xlu0 %1068  ;;  %v1097_v18 = vpop.permute.xlu1 %1096  ;;  %2301 = vmatprep.mubr.msk.f32.mxu1 %vm2665_vm3, %v2666_v11 }
 0x41d   :  { %v1113_v24 = vsel %vm713_vm12, %v3167_v50, %v1069_v33  ;;  %v2379_v50 = vpack.c.bf16 %v1403_v49, %v1402_v48 }
 0x41e   :  { %v1120_v36 = vsel %vm1118_vm14, %v1113_v24, %v1097_v18 }
 0x41f   :  { %2266 = vmatmul.mubr.msk.f32.gmra.mrb[22].mxu0 %vm1137_vm15, %v1120_v36  ;;  %2302 = vmatmul.mubr.msk.f32.gmra.mrb[24].mxu1 %vm1137_vm15, %v1124_v35 }
 0x420   :  { %v1071_v34 = vpop.permute.xlu0 %1070  ;;  %v1099_v37 = vpop.permute.xlu1 %1098  ;;  %2268 = vmatprep.mubr.msk.f32.mxu0 %vm2665_vm3, %v2666_v11  ;;  %v1401_v11 = vld [vmem:[%s3438_s10 + $0x18] sm:$0xff]  ;;  %vm1842_vm3 = vcmask 1041409  }
 0x421   :  { %v1114_v39 = vsel %vm713_vm12, %v1046_v15, %v1071_v34  ;;  %v2376_v47 = vpack.c.bf16 %v1401_v11, %v1400_v44  ;;  %v2403_v15 = vpack.c.bf16 %v1419_v14, %v1418_v62  ;;  %v1698_v62 = vld [vmem:[#allocation3 + $0x28] sm:$0xff]  ;;  %v1700_v14 = vld [vmem:[#allocation3 + $0x38] sm:$0xff] }
 0x422   :  { %v1121_v40 = vsel %vm1118_vm14, %v1114_v39, %v1099_v37 }
 0x423   :  { %2269 = vmatmul.mubr.msk.f32.gmra.mrb[24].mxu0 %vm1137_vm15, %v1121_v40  ;;  %2413 = vmatpush1.bf16.msra.mxu1 %v2376_v47 }
 0x424   :  { %2377 = vmatpush1.bf16.msra.mxu0 %v2376_v47  ;;  %2414 = vmatprep.subr.bf16.mxu1 %v2663_v9 }
 0x425   :  { %2378 = vmatprep.subr.bf16.mxu0 %v2663_v9 }
 0x427   :  { %2416 = vmatpush1.bf16.msra.mxu1 %v2379_v50 }
 0x428   :  { %2380 = vmatpush1.bf16.msra.mxu0 %v2379_v50  ;;  %2417 = vmatprep.subr.bf16.mxu1 %v2663_v9 }
 0x429   :  { %2381 = vmatprep.subr.bf16.mxu0 %v2663_v9 }
 0x42b   :  { %2419 = vmatpush1.bf16.msra.mxu1 %v2382_v57 }
 0x42c   :  { %2383 = vmatpush1.bf16.msra.mxu0 %v2382_v57  ;;  %2420 = vmatprep.subr.bf16.mxu1 %v2663_v9 }
 0x42d   :  { %2384 = vmatprep.subr.bf16.mxu0 %v2663_v9 }
 0x42f   :  { %2422 = vmatpush1.bf16.msra.mxu1 %v2385_v59 }
 0x430   :  { %2386 = vmatpush1.bf16.msra.mxu0 %v2385_v59  ;;  %2423 = vmatprep.subr.bf16.mxu1 %v2663_v9  ;;  %v1694_v59 = vld [vmem:[#allocation3 + $0x8] sm:$0xff] }
 0x431   :  { %2387 = vmatprep.subr.bf16.mxu0 %v2663_v9  ;;  %v2444_v3 = vpack.c.bf16 %v1696_v60, %v1694_v59  ;;  %v1765_v59 = vld [vmem:[#allocation3 + $0x240] sm:$0xff]  ;;  %v1767_v60 = vld [vmem:[#allocation3 + $0x250] sm:$0xff] }
 0x433   :  { %2425 = vmatpush1.bf16.msra.mxu1 %v2388_v0 }
 0x434   :  { %2389 = vmatpush1.bf16.msra.mxu0 %v2388_v0  ;;  %2426 = vmatprep.subr.bf16.mxu1 %v2663_v9 }
 0x435   :  { %2390 = vmatprep.subr.bf16.mxu0 %v2663_v9 }
 0x437   :  { %2428 = vmatpush1.bf16.msra.mxu1 %v2391_v45 }
 0x438   :  { %2392 = vmatpush1.bf16.msra.mxu0 %v2391_v45  ;;  %2429 = vmatprep.subr.bf16.mxu1 %v2663_v9 }
 0x439   :  { %2393 = vmatprep.subr.bf16.mxu0 %v2663_v9 }
 0x43b   :  { %2431 = vmatpush1.bf16.msra.mxu1 %v2394_v7 }
 0x43c   :  { %2395 = vmatpush1.bf16.msra.mxu0 %v2394_v7  ;;  %2432 = vmatprep.subr.bf16.mxu1 %v2663_v9  ;;  %v1760_v7 = vld [vmem:[#allocation3 + $0x218] sm:$0xff] }
 0x43d   :  { %2396 = vmatprep.subr.bf16.mxu0 %v2663_v9 }
 0x43f   :  { %2434 = vmatpush1.bf16.msra.mxu1 %v2397_v10 }
 0x440   :  { %2398 = vmatpush1.bf16.msra.mxu0 %v2397_v10  ;;  %2435 = vmatprep.subr.bf16.mxu1 %v2663_v9  ;;  %v2508_v10 = vpack.c.bf16 %v1760_v7, %v1758_v6  ;;  %v2518_v6 = vpack.c.bf16 %v1767_v60, %v1765_v59  ;;  %v1709_v7 = vld [vmem:[#allocation3 + $0x80] sm:$0xff] }
 0x441   :  { %2399 = vmatprep.subr.bf16.mxu0 %v2663_v9  ;;  %v1785_v60 = vld [vmem:[#allocation3 + $0x2e0] sm:$0xff] }
 0x443   :  { %2437 = vmatpush1.bf16.msra.mxu1 %v2400_v13 }
 0x444   :  { %2401 = vmatpush1.bf16.msra.mxu0 %v2400_v13  ;;  %2438 = vmatprep.subr.bf16.mxu1 %v2663_v9  ;;  %v1695_v13 = vld [vmem:[#allocation3 + $0x10] sm:$0xff] }
 0x445   :  { %2402 = vmatprep.subr.bf16.mxu0 %v2663_v9  ;;  %v2446_v17 = vpack.c.bf16 %v1695_v13, %v1693_v55  ;;  %v1771_v55 = vld [vmem:[#allocation3 + $0x270] sm:$0xff]  ;;  %v1714_v13 = vld [vmem:[#allocation3 + $0xa8] sm:$0xff] }
 0x447   :  { %2440 = vmatpush1.bf16.msra.mxu1 %v2403_v15 }
 0x448   :  { %2404 = vmatpush1.bf16.msra.mxu0 %v2403_v15  ;;  %2441 = vmatprep.subr.bf16.mxu1 %v2663_v9 }
 0x449   :  { %2405 = vmatprep.subr.bf16.mxu0 %v2663_v9 }
 0x44b   :  { %2443 = vmatpush1.bf16.msra.mxu1 %v2406_v19 }
 0x44c   :  { %2407 = vmatpush1.bf16.msra.mxu0 %v2406_v19  ;;  %2445 = vmatprep.subr.bf16.mxu1 %v2444_v3  ;;  %v2448_v19 = vpack.c.bf16 %v1700_v14, %v1698_v62  ;;  %v1770_v3 = vld [vmem:[#allocation3 + $0x268] sm:$0xff]  ;;  %v1716_v62 = vld [vmem:[#allocation3 + $0xb8] sm:$0xff] }
 0x44d   :  { %2509 = vmatprep.subr.bf16.mxu0 %v2508_v10  ;;  %v1774_v14 = vld [vmem:[#allocation3 + $0x288] sm:$0xff] }
 0x4dd   :  { %v1302_v21 = vpop.f32.mrb[20].mxu1 }
 0x4de   :  { %v2297_v22 = vpop.f32.mrb[21].mxu1  ;;  %v1326_v26 = vmul.f32 %v2063_v25, %v1302_v21  ;;  %v1697_v21 = vld [vmem:[#allocation3 + $0x20] sm:$0xff] }
 0x4df   :  { %v1699_v22 = vld [vmem:[#allocation3 + $0x30] sm:$0xff] }
 0x4e0   :  { %v1339_v27 = vadd.f32 %v2064_v42, %v1326_v26  ;;  %v1702_v26 = vld [vmem:[#allocation3 + $0x48] sm:$0xff] }
 0x4e1   :  { %v1213_v30 = vpop.f32.mrb[20].mxu0 }
 0x4e2   :  { %v2264_v23 = vpop.f32.mrb[21].mxu0  ;;  %v1323_v28 = vmul.f32 %v2063_v25, %v1213_v30  ;;  %v3329_v29 = vmax.f32 %v1339_v27, 0.0 }
 0x4e3   :  { %v1757_v23 = vld [vmem:[#allocation3 + $0x200] sm:$0xff] }
 0x4e4   :  { %v1336_v31 = vadd.f32 %v2064_v42, %v1323_v28  ;;  %v1387_v34 = vrot.slane %v3329_v29, 2  ;;  %v1359_v46 = vrot.slane %v3329_v29, 1  ;;  %v1704_v28 = vld [vmem:[#allocation3 + $0x58] sm:$0xff] }
 0x4e6   :  { %v3334_v37 = vmax.f32 %v1336_v31, 0.0 }
 0x4e8   :  { %v1382_v56 = vrot.slane %v3334_v37, 2  ;;  %v1354_v54 = vrot.slane %v3334_v37, 1 }
 0x4ee   :  { %v1307_v20 = vpop.f32.mrb[22].mxu1 }
 0x4ef   :  { %v1327_v52 = vmul.f32 %v2063_v25, %v1307_v20  ;;  %v2300_v9 = vpop.f32.mrb[23].mxu1  ;;  %v1762_v20 = vld [vmem:[#allocation3 + $0x228] sm:$0xff] }
 0x4f1   :  { %v1340_v8 = vadd.f32 %v2064_v42, %v1327_v52  ;;  %v1764_v52 = vld [vmem:[#allocation3 + $0x238] sm:$0xff] }
 0x4f2   :  { %v1218_v32 = vpop.f32.mrb[22].mxu0  ;;  %v1312_v61 = vpop.f32.mrb[24].mxu1 }
 0x4f3   :  { %v3331_v33 = vmax.f32 %v1340_v8, 0.0  ;;  %v1324_v18 = vmul.f32 %v2063_v25, %v1218_v32  ;;  %v1328_v24 = vmul.f32 %v2063_v25, %v1312_v61  ;;  %v2267_v35 = vpop.f32.mrb[23].mxu0  ;;  %v2303_v36 = vpop.f32.mrb[25].mxu1  ;;  %v2450_v8 = vpack.c.bf16 %v1699_v22, %v1697_v21  ;;  %v1703_v61 = vld [vmem:[#allocation3 + $0x50] sm:$0xff] }
 0x4f4   :  { %v2452_v36 = vpack.c.bf16 %v1704_v28, %v1702_v26  ;;  %v1715_v21 = vld [vmem:[#allocation3 + $0xb0] sm:$0xff]  ;;  %v1720_v26 = vld [vmem:[#allocation3 + $0xd8] sm:$0xff] }
 0x4f5   :  { %v1388_v39 = vrot.slane %v3331_v33, 2  ;;  %v1337_v40 = vadd.f32 %v2064_v42, %v1324_v18  ;;  %v1341_v41 = vadd.f32 %v2064_v42, %v1328_v24  ;;  %v1360_v43 = vrot.slane %v3331_v33, 1  ;;  %v1761_v18 = vld [vmem:[#allocation3 + $0x220] sm:$0xff] }
 0x4f6   :  { %v1223_v44 = vpop.f32.mrb[24].mxu0 }
 0x4f7   :  { %v3339_v11 = vmax.f32 %v1337_v40, 0.0  ;;  %v3341_v47 = vmax.f32 %v1341_v41, 0.0  ;;  %v1325_v48 = vmul.f32 %v2063_v25, %v1223_v44  ;;  %v2270_v49 = vpop.f32.mrb[25].mxu0  ;;  %v1389_v50 = vsel %vm124_vm9, %v1387_v34, %v1388_v39  ;;  %v1759_v25 = vld [vmem:[#allocation3 + $0x210] sm:$0xff]  ;;  %v1706_v40 = vld [vmem:[#allocation3 + $0x68] sm:$0xff]  ;;  %v1708_v41 = vld [vmem:[#allocation3 + $0x78] sm:$0xff] }
 0x4f8   :  { %2068 = vmatprep.mubr.msk.f32.mxu1 %vm1118_vm14, %v1389_v50  ;;  %v1361_v53 = vsel %vm126_vm0, %v1359_v46, %v1360_v43  ;;  %v2510_v32 = vpack.c.bf16 %v1759_v25, %v1757_v23  ;;  %v2512_v34 = vpack.c.bf16 %v1764_v52, %v1762_v20  ;;  %v1766_v44 = vld [vmem:[#allocation3 + $0x248] sm:$0xff]  ;;  %v1768_v46 = vld [vmem:[#allocation3 + $0x258] sm:$0xff]  ;;  %v2456_v50 = vpack.c.bf16 %v1708_v41, %v1706_v40  ;;  %v1775_v23 = vld [vmem:[#allocation3 + $0x290] sm:$0xff] }
 0x4f9   :  { %v1383_v57 = vrot.slane %v3339_v11, 2  ;;  %v1338_v38 = vadd.f32 %v2064_v42, %v1325_v48  ;;  %1370 = vrot.lane.b32.xlu0 %v1361_v53, %s2670_s5  ;;  %v1362_v58 = vrot.slane %v3341_v47, 1  ;;  %v1355_v0 = vrot.slane %v3339_v11, 1  ;;  %v1705_v53 = vld [vmem:[#allocation3 + $0x60] sm:$0xff]  ;;  %v1718_v25 = vld [vmem:[#allocation3 + $0xc8] sm:$0xff] }
 0x4fa   :  { %v1390_v15 = vrot.slane %v3341_v47, 2  ;;  %v1717_v52 = vld [vmem:[#allocation3 + $0xc0] sm:$0xff] }
 0x4fb   :  { %v3352_v4 = vmax.f32 %v1338_v38, 0.0  ;;  %v1363_v45 = vsel %vm126_vm0, %v1360_v43, %v1362_v58  ;;  %v1384_v5 = vsel %vm124_vm9, %v1382_v56, %v1383_v57  ;;  %v1356_v51 = vsel %vm126_vm0, %v1354_v54, %v1355_v0  ;;  %v1707_v56 = vld [vmem:[#allocation3 + $0x70] sm:$0xff]  ;;  %v1710_v54 = vld [vmem:[#allocation3 + $0x88] sm:$0xff] }
 0x4fc   :  { %2065 = vmatprep.mubr.msk.f32.mxu0 %vm1118_vm14, %v1384_v5  ;;  %1364 = vrot.lane.b32.xlu1 %v1356_v51, %s2670_s5  ;;  %v1391_v27 = vsel %vm124_vm9, %v1388_v39, %v1390_v15  ;;  %v1763_v39 = vld [vmem:[#allocation3 + $0x230] sm:$0xff] }
 0x4fd   :  { %1372 = vrot.lane.b32.xlu0 %v1363_v45, %s2670_s5  ;;  %v1357_v63 = vrot.slane %v3352_v4, 1  ;;  %v1385_v42 = vrot.slane %v3352_v4, 2  ;;  %v2514_v49 = vpack.c.bf16 %v1763_v39, %v1761_v18  ;;  %v1772_v45 = vld [vmem:[#allocation3 + $0x278] sm:$0xff]  ;;  %v1721_v39 = vld [vmem:[#allocation3 + $0xe0] sm:$0xff] }
 0x4fe   :  { %v2520_v10 = vpack.c.bf16 %v1772_v45, %v1770_v3  ;;  %v1724_v18 = vld [vmem:[#allocation3 + $0xf8] sm:$0xff]  ;;  %v1730_v3 = vld [vmem:[#allocation3 + $0x128] sm:$0xff] }
 0x4ff   :  { %v1358_v12 = vsel %vm126_vm0, %v1355_v0, %v1357_v63  ;;  %v1386_v43 = vsel %vm124_vm9, %v1383_v57, %v1385_v42  ;;  %v1712_v0 = vld [vmem:[#allocation3 + $0x98] sm:$0xff]  ;;  %vm1640_vm0 = vcmask 1047557  }
 0x500   :  { %1366 = vrot.lane.b32.xlu1 %v1358_v12, %s2670_s5  ;;  %v1769_v12 = vld [vmem:[#allocation3 + $0x260] sm:$0xff]  ;;  %v1732_v45 = vld [vmem:[#allocation3 + $0x138] sm:$0xff] }
 0x501   :  { %1374 = vrot.lane.b32.xlu0 %v1362_v58, %s2670_s5  ;;  %v2516_v58 = vpack.c.bf16 %v1768_v46, %v1766_v44  ;;  %v1781_v44 = vld [vmem:[#allocation3 + $0x2c0] sm:$0xff]  ;;  %v1783_v46 = vld [vmem:[#allocation3 + $0x2d0] sm:$0xff] }
 0x504   :  { %1368 = vrot.lane.b32.xlu1 %v1357_v63, %s2670_s5  ;;  %v2460_v63 = vpack.c.bf16 %v1712_v0, %v1710_v54  ;;  %v1787_v54 = vld [vmem:[#allocation3 + $0x2f0] sm:$0xff] }
 0x505   :  { %v2538_v0 = vpack.c.bf16 %v1787_v54, %v1785_v60  ;;  %v1750_v54 = vld [vmem:[#allocation3 + $0x1c8] sm:$0xff] }
 0x56b   :  { %v1371_v16 = vpop.permute.xlu0 %1370 }
 0x56c   :  { %v1395_v30 = vsel %vm1118_vm14, %v3329_v29, %v1371_v16  ;;  %v1701_v29 = vld [vmem:[#allocation3 + $0x40] sm:$0xff]  ;;  %v2522_v16 = vpack.c.bf16 %v1771_v55, %v1769_v12 }
 0x56d   :  { %1579 = vmatmul.mubr.f32.vlgmr.msra.gmra.mrb[26].mxu1 %v1395_v30  ;;  %v1773_v30 = vld [vmem:[#allocation3 + $0x280] sm:$0xff] }
 0x56e   :  { %2069 = vmatprep.mubr.msk.f32.mxu1 %vm1118_vm14, %v1391_v27  ;;  %2447 = vmatpush1.bf16.msra.mxu1 %v2446_v17  ;;  %v1365_v31 = vpop.permute.xlu1 %1364  ;;  %v1780_v27 = vld [vmem:[#allocation3 + $0x2b8] sm:$0xff]  ;;  %v2526_v20 = vpack.c.bf16 %v1775_v23, %v1773_v30  ;;  %v1795_v30 = vld [vmem:[#allocation3 + $0x330] sm:$0xff] }
 0x56f   :  { %v1373_v9 = vpop.permute.xlu0 %1372  ;;  %2449 = vmatprep.subr.bf16.mxu1 %v2448_v19  ;;  %v1392_v24 = vsel %vm1118_vm14, %v3334_v37, %v1365_v31  ;;  %v1713_v19 = vld [vmem:[#allocation3 + $0xa0] sm:$0xff]  ;;  %v2468_v31 = vpack.c.bf16 %v1720_v26, %v1718_v25  ;;  %v1738_v25 = vld [vmem:[#allocation3 + $0x168] sm:$0xff]  ;;  %v1740_v26 = vld [vmem:[#allocation3 + $0x178] sm:$0xff] }
 0x570   :  { %v1396_v35 = vsel %vm1118_vm14, %v3331_v33, %v1373_v9  ;;  %1493 = vmatmul.mubr.f32.vlgmr.msra.gmra.mrb[26].mxu0 %v1392_v24  ;;  %v2454_v33 = vpack.c.bf16 %v1703_v61, %v1701_v29  ;;  %v2466_v28 = vpack.c.bf16 %v1715_v21, %v1713_v19  ;;  %v1719_v9 = vld [vmem:[#allocation3 + $0xd0] sm:$0xff]  ;;  %v1722_v61 = vld [vmem:[#allocation3 + $0xe8] sm:$0xff] }
 0x571   :  { %1584 = vmatmul.mubr.f32.gmra.mrb[28].mxu1 %v1396_v35  ;;  %2066 = vmatprep.mubr.msk.f32.mxu0 %vm1118_vm14, %v1386_v43  ;;  %v1779_v29 = vld [vmem:[#allocation3 + $0x2b0] sm:$0xff]  ;;  %v1782_v24 = vld [vmem:[#allocation3 + $0x2c8] sm:$0xff]  ;;  %v1784_v35 = vld [vmem:[#allocation3 + $0x2d8] sm:$0xff]  ;;  %v2472_v40 = vpack.c.bf16 %v1724_v18, %v1722_v61 }
 0x572   :  { %2070 = vmatprep.mubr.msk.f32.mxu1 %vm1118_vm14, %v1390_v15  ;;  %v1367_v48 = vpop.permute.xlu1 %1366  ;;  %2451 = vmatpush1.bf16.msra.mxu1 %v2450_v8  ;;  %v1776_v15 = vld [vmem:[#allocation3 + $0x298] sm:$0xff]  ;;  %v2532_v41 = vpack.c.bf16 %v1784_v35, %v1782_v24  ;;  %v1723_v43 = vld [vmem:[#allocation3 + $0xf0] sm:$0xff]  ;;  %v1742_v61 = vld [vmem:[#allocation3 + $0x188] sm:$0xff] }
 0x573   :  { %v1375_v37 = vpop.permute.xlu0 %1374  ;;  %2511 = vmatpush1.bf16.msra.mxu0 %v2510_v32  ;;  %v1393_v38 = vsel %vm1118_vm14, %v3339_v11, %v1367_v48  ;;  %2453 = vmatprep.subr.bf16.mxu1 %v2452_v36  ;;  %v2458_v11 = vpack.c.bf16 %v1707_v56, %v1705_v53  ;;  %v2524_v22 = vpack.c.bf16 %v1776_v15, %v1774_v14  ;;  %v1777_v32 = vld [vmem:[#allocation3 + $0x2a0] sm:$0xff]  ;;  %v1788_v56 = vld [vmem:[#allocation3 + $0x2f8] sm:$0xff]  ;;  %v1794_v14 = vld [vmem:[#allocation3 + $0x328] sm:$0xff] }
 0x574   :  { %v1397_v57 = vsel %vm1118_vm14, %v3341_v47, %v1375_v37  ;;  %2513 = vmatprep.subr.bf16.mxu0 %v2512_v34  ;;  %1498 = vmatmul.mubr.f32.gmra.mrb[28].mxu0 %v1393_v38  ;;  %v1711_v47 = vld [vmem:[#allocation3 + $0x90] sm:$0xff]  ;;  %v2470_v36 = vpack.c.bf16 %v1719_v9, %v1717_v52  ;;  %v2530_v34 = vpack.c.bf16 %v1779_v29, %v1777_v32  ;;  %v1725_v38 = vld [vmem:[#allocation3 + $0x100] sm:$0xff]  ;;  %v1744_v18 = vld [vmem:[#allocation3 + $0x198] sm:$0xff] }
 0x575   :  { %1589 = vmatmul.mubr.f32.gmra.mrb[30].mxu1 %v1397_v57  ;;  %2067 = vmatprep.mubr.msk.f32.mxu0 %vm1118_vm14, %v1385_v42  ;;  %v2462_v17 = vpack.c.bf16 %v1711_v47, %v1709_v7  ;;  %v1778_v42 = vld [vmem:[#allocation3 + $0x2a8] sm:$0xff]  ;;  %v2474_v37 = vpack.c.bf16 %v1723_v43, %v1721_v39  ;;  %v2534_v48 = vpack.c.bf16 %v1783_v46, %v1781_v44  ;;  %v1727_v57 = vld [vmem:[#allocation3 + $0x110] sm:$0xff]  ;;  %v1729_v7 = vld [vmem:[#allocation3 + $0x120] sm:$0xff] }
 0x576   :  { %v1369_v5 = vpop.permute.xlu1 %1368  ;;  %2455 = vmatpush1.bf16.msra.mxu1 %v2454_v33  ;;  %v2528_v8 = vpack.c.bf16 %v1780_v27, %v1778_v42  ;;  %v1726_v33 = vld [vmem:[#allocation3 + $0x108] sm:$0xff]  ;;  %v2478_v59 = vpack.c.bf16 %v1727_v57, %v1725_v38  ;;  %v1735_v19 = vld [vmem:[#allocation3 + $0x150] sm:$0xff]  ;;  %v2488_v27 = vpack.c.bf16 %v1740_v26, %v1738_v25  ;;  %v2492_v35 = vpack.c.bf16 %v1744_v18, %v1742_v61  ;;  %v1801_v43 = vld [vmem:[#allocation3 + $0x360] sm:$0xff] }
 0x577   :  { %2515 = vmatpush1.bf16.msra.mxu0 %v2514_v49  ;;  %v1394_v51 = vsel %vm1118_vm14, %v3352_v4, %v1369_v5  ;;  %2457 = vmatprep.subr.bf16.mxu1 %v2456_v50  ;;  %v2464_v4 = vpack.c.bf16 %v1716_v62, %v1714_v13  ;;  %v1728_v49 = vld [vmem:[#allocation3 + $0x118] sm:$0xff]  ;;  %v1786_v50 = vld [vmem:[#allocation3 + $0x2e8] sm:$0xff]  ;;  %v2480_v5 = vpack.c.bf16 %v1732_v45, %v1730_v3  ;;  %v1739_v52 = vld [vmem:[#allocation3 + $0x170] sm:$0xff] }
 0x578   :  { %2517 = vmatprep.subr.bf16.mxu0 %v2516_v58  ;;  %1503 = vmatmul.mubr.f32.gmra.mrb[30].mxu0 %v1394_v51  ;;  %v2476_v53 = vpack.c.bf16 %v1728_v49, %v1726_v33  ;;  %v2536_v58 = vpack.c.bf16 %v1788_v56, %v1786_v50  ;;  %v1731_v51 = vld [vmem:[#allocation3 + $0x130] sm:$0xff]  ;;  %v1734_v13 = vld [vmem:[#allocation3 + $0x148] sm:$0xff]  ;;  %v1736_v62 = vld [vmem:[#allocation3 + $0x158] sm:$0xff] }
 0x579   :  { %v2482_v12 = vpack.c.bf16 %v1731_v51, %v1729_v7  ;;  %v2484_v15 = vpack.c.bf16 %v1736_v62, %v1734_v13  ;;  %v1798_v42 = vld [vmem:[#allocation3 + $0x348] sm:$0xff]  ;;  %v1799_v32 = vld [vmem:[#allocation3 + $0x350] sm:$0xff]  ;;  %v1808_v50 = vld [vmem:[#allocation3 + $0x398] sm:$0xff] }
 0x57a   :  { %2459 = vmatpush1.bf16.msra.mxu1 %v2458_v11  ;;  %v1790_v11 = vld [vmem:[#allocation3 + $0x308] sm:$0xff]  ;;  %v1743_v39 = vld [vmem:[#allocation3 + $0x190] sm:$0xff]  ;;  %v1809_v51 = vld [vmem:[#allocation3 + $0x3a0] sm:$0xff] }
 0x57b   :  { %2519 = vmatpush1.bf16.msra.mxu0 %v2518_v6  ;;  %2461 = vmatprep.subr.bf16.mxu1 %v2460_v63  ;;  %v1792_v6 = vld [vmem:[#allocation3 + $0x318] sm:$0xff]  ;;  %v1789_v63 = vld [vmem:[#allocation3 + $0x300] sm:$0xff]  ;;  %v1802_v24 = vld [vmem:[#allocation3 + $0x368] sm:$0xff] }
 0x57c   :  { %2521 = vmatprep.subr.bf16.mxu0 %v2520_v10  ;;  %v2540_v47 = vpack.c.bf16 %v1792_v6, %v1790_v11  ;;  %v1791_v10 = vld [vmem:[#allocation3 + $0x310] sm:$0xff]  ;;  %v1806_v33 = vld [vmem:[#allocation3 + $0x388] sm:$0xff]  ;;  %v1749_v11 = vld [vmem:[#allocation3 + $0x1c0] sm:$0xff] }
 0x57d   :  { %v2542_v55 = vpack.c.bf16 %v1791_v10, %v1789_v63  ;;  %v1803_v44 = vld [vmem:[#allocation3 + $0x370] sm:$0xff]  ;;  %v2556_v38 = vpack.c.bf16 %v1808_v50, %v1806_v33  ;;  %v1810_v3 = vld [vmem:[#allocation3 + $0x3a8] sm:$0xff]  ;;  %v1816_v62 = vld [vmem:[#allocation3 + $0x3d8] sm:$0xff] }
 0x57e   :  { %2463 = vmatpush1.bf16.msra.mxu1 %v2462_v17  ;;  %v1796_v17 = vld [vmem:[#allocation3 + $0x338] sm:$0xff]  ;;  %v2554_v46 = vpack.c.bf16 %v1803_v44, %v1801_v43  ;;  %v1747_v56 = vld [vmem:[#allocation3 + $0x1b0] sm:$0xff]  ;;  %v1754_v10 = vld [vmem:[#allocation3 + $0x1e8] sm:$0xff] }
 0x57f   :  { %2523 = vmatpush1.bf16.msra.mxu0 %v2522_v16  ;;  %2465 = vmatprep.subr.bf16.mxu1 %v2464_v4  ;;  %v1733_v16 = vld [vmem:[#allocation3 + $0x140] sm:$0xff]  ;;  %v2544_v21 = vpack.c.bf16 %v1796_v17, %v1794_v14  ;;  %v1751_v6 = vld [vmem:[#allocation3 + $0x1d0] sm:$0xff]  ;;  %v1814_v13 = vld [vmem:[#allocation3 + $0x3c8] sm:$0xff] }
 0x580   :  { %2525 = vmatprep.subr.bf16.mxu0 %v2524_v22  ;;  %v2486_v4 = vpack.c.bf16 %v1735_v19, %v1733_v16  ;;  %v1793_v22 = vld [vmem:[#allocation3 + $0x320] sm:$0xff]  ;;  %v1811_v63 = vld [vmem:[#allocation3 + $0x3b0] sm:$0xff] }
 0x581   :  { %v2546_v23 = vpack.c.bf16 %v1795_v30, %v1793_v22  ;;  %v1753_v17 = vld [vmem:[#allocation3 + $0x1e0] sm:$0xff]  ;;  %v1755_v16 = vld [vmem:[#allocation3 + $0x1f0] sm:$0xff]  ;;  %v1818_v30 = vld [vmem:[#allocation3 + $0x3e8] sm:$0xff] }
 0x582   :  { %2467 = vmatpush1.bf16.msra.mxu1 %v2466_v28  ;;  %v1800_v28 = vld [vmem:[#allocation3 + $0x358] sm:$0xff]  ;;  %v1813_v19 = vld [vmem:[#allocation3 + $0x3c0] sm:$0xff] }
 0x583   :  { %2527 = vmatpush1.bf16.msra.mxu0 %v2526_v20  ;;  %2469 = vmatprep.subr.bf16.mxu1 %v2468_v31  ;;  %v1737_v20 = vld [vmem:[#allocation3 + $0x160] sm:$0xff]  ;;  %v2548_v9 = vpack.c.bf16 %v1800_v28, %v1798_v42  ;;  %v1819_v42 = vld [vmem:[#allocation3 + $0x3f0] sm:$0xff] }
 0x584   :  { %2529 = vmatprep.subr.bf16.mxu0 %v2528_v8  ;;  %v2490_v31 = vpack.c.bf16 %v1739_v52, %v1737_v20  ;;  %v1797_v8 = vld [vmem:[#allocation3 + $0x340] sm:$0xff] }
 0x585   :  { %v2550_v29 = vpack.c.bf16 %v1799_v32, %v1797_v8  ;;  %v1817_v26 = vld [vmem:[#allocation3 + $0x3e0] sm:$0xff] }
 0x586   :  { %2471 = vmatpush1.bf16.msra.mxu1 %v2470_v36  ;;  %v1804_v36 = vld [vmem:[#allocation3 + $0x378] sm:$0xff]  ;;  %v2071_v28 = vld [vmem:[%s3439_s11] ss:$0 sm:$0xff] }
 0x587   :  { %2531 = vmatpush1.bf16.msra.mxu0 %v2530_v34  ;;  %2473 = vmatprep.subr.bf16.mxu1 %v2472_v40  ;;  %v1741_v34 = vld [vmem:[#allocation3 + $0x180] sm:$0xff]  ;;  %v2552_v40 = vpack.c.bf16 %v1804_v36, %v1802_v24 }
 0x588   :  { %2533 = vmatprep.subr.bf16.mxu0 %v2532_v41  ;;  %v2494_v41 = vpack.c.bf16 %v1743_v39, %v1741_v34  ;;  %v2072_v52 = vld [vmem:[%s3440_s12] ss:$0 sm:$0xff] }
 0x58a   :  { %2475 = vmatpush1.bf16.msra.mxu1 %v2474_v37  ;;  %v1746_v37 = vld [vmem:[#allocation3 + $0x1a8] sm:$0xff] }
 0x58b   :  { %2535 = vmatpush1.bf16.msra.mxu0 %v2534_v48  ;;  %2477 = vmatprep.subr.bf16.mxu1 %v2476_v53  ;;  %v1748_v48 = vld [vmem:[#allocation3 + $0x1b8] sm:$0xff]  ;;  %v1745_v53 = vld [vmem:[#allocation3 + $0x1a0] sm:$0xff] }
 0x58c   :  { %2537 = vmatprep.subr.bf16.mxu0 %v2536_v58  ;;  %v2496_v49 = vpack.c.bf16 %v1748_v48, %v1746_v37  ;;  %v2498_v57 = vpack.c.bf16 %v1747_v56, %v1745_v53  ;;  %v1805_v58 = vld [vmem:[#allocation3 + $0x380] sm:$0xff] }
 0x58e   :  { %2479 = vmatpush1.bf16.msra.mxu1 %v2478_v59  ;;  %v1807_v59 = vld [vmem:[#allocation3 + $0x390] sm:$0xff] }
 0x58f   :  { %2539 = vmatpush1.bf16.msra.mxu0 %v2538_v0  ;;  %2481 = vmatprep.subr.bf16.mxu1 %v2480_v5  ;;  %v2558_v60 = vpack.c.bf16 %v1807_v59, %v1805_v58  ;;  %v1752_v0 = vld [vmem:[#allocation3 + $0x1d8] sm:$0xff] }
 0x590   :  { %2541 = vmatprep.subr.bf16.mxu0 %v2540_v47  ;;  %v2500_v45 = vpack.c.bf16 %v1752_v0, %v1750_v54  ;;  %v1812_v5 = vld [vmem:[#allocation3 + $0x3b8] sm:$0xff]  ;;  %v2502_v47 = vpack.c.bf16 %v1751_v6, %v1749_v11 }
 0x591   :  { %v2560_v7 = vpack.c.bf16 %v1812_v5, %v1810_v3 }
 0x592   :  { %2483 = vmatpush1.bf16.msra.mxu1 %v2482_v12  ;;  %v2562_v12 = vpack.c.bf16 %v1811_v63, %v1809_v51 }
 0x593   :  { %2543 = vmatpush1.bf16.msra.mxu0 %v2542_v55  ;;  %2485 = vmatprep.subr.bf16.mxu1 %v2484_v15  ;;  %v1756_v55 = vld [vmem:[#allocation3 + $0x1f8] sm:$0xff]  ;;  %v2564_v15 = vpack.c.bf16 %v1816_v62, %v1814_v13 }
 0x594   :  { %2545 = vmatprep.subr.bf16.mxu0 %v2544_v21  ;;  %v2504_v14 = vpack.c.bf16 %v1756_v55, %v1754_v10  ;;  %v2506_v21 = vpack.c.bf16 %v1755_v16, %v1753_v17 }
 0x596   :  { %2487 = vmatpush1.bf16.msra.mxu1 %v2486_v4  ;;  %v1815_v4 = vld [vmem:[#allocation3 + $0x3d0] sm:$0xff] }
 0x597   :  { %2547 = vmatpush1.bf16.msra.mxu0 %v2546_v23  ;;  %2489 = vmatprep.subr.bf16.mxu1 %v2488_v27  ;;  %v2566_v22 = vpack.c.bf16 %v1815_v4, %v1813_v19  ;;  %v1820_v23 = vld [vmem:[#allocation3 + $0x3f8] sm:$0xff]  ;;  %v2570_v27 = vpack.c.bf16 %v1819_v42, %v1817_v26 }
 0x598   :  { %2549 = vmatprep.subr.bf16.mxu0 %v2548_v9  ;;  %v2568_v25 = vpack.c.bf16 %v1820_v23, %v1818_v30 }
 0x59a   :  { %2491 = vmatpush1.bf16.msra.mxu1 %v2490_v31 }
 0x59b   :  { %2551 = vmatpush1.bf16.msra.mxu0 %v2550_v29  ;;  %2493 = vmatprep.subr.bf16.mxu1 %v2492_v35 }
 0x59c   :  { %2553 = vmatprep.subr.bf16.mxu0 %v2552_v40 }
 0x59e   :  { %2495 = vmatpush1.bf16.msra.mxu1 %v2494_v41 }
 0x59f   :  { %2555 = vmatpush1.bf16.msra.mxu0 %v2554_v46  ;;  %2497 = vmatprep.subr.bf16.mxu1 %v2496_v49 }
 0x5a0   :  { %2557 = vmatprep.subr.bf16.mxu0 %v2556_v38 }
 0x5a2   :  { %2499 = vmatpush1.bf16.msra.mxu1 %v2498_v57 }
 0x5a3   :  { %2559 = vmatpush1.bf16.msra.mxu0 %v2558_v60  ;;  %2501 = vmatprep.subr.bf16.mxu1 %v2500_v45 }
 0x5a4   :  { %2561 = vmatprep.subr.bf16.mxu0 %v2560_v7 }
 0x5a6   :  { %2503 = vmatpush1.bf16.msra.mxu1 %v2502_v47 }
 0x5a7   :  { %2563 = vmatpush1.bf16.msra.mxu0 %v2562_v12  ;;  %2505 = vmatprep.subr.bf16.mxu1 %v2504_v14 }
 0x5a8   :  { %2565 = vmatprep.subr.bf16.mxu0 %v2564_v15 }
 0x5aa   :  { %2507 = vmatpush1.bf16.msra.mxu1 %v2506_v21 }
 0x5ab   :  { %2567 = vmatpush1.bf16.msra.mxu0 %v2566_v22 }
 0x5ac   :  { %2569 = vmatprep.subr.bf16.mxu0 %v2568_v25 }
 0x5af   :  { %2571 = vmatpush1.bf16.msra.mxu0 %v2570_v27 }
 0x640   :  { %v1580_v20 = vpop.f32.mrb[26].mxu1 }
 0x641   :  { %v1604_v9 = vmul.f32 %v2071_v28, %v1580_v20  ;;  %v1582_v31 = vpop.f32.mrb[27].mxu1 }
 0x643   :  { %v1617_v8 = vadd.f32 %v2072_v52, %v1604_v9  ;;  %v1494_v32 = vpop.f32.mrb[26].mxu0 }
 0x644   :  { %v1585_v29 = vpop.f32.mrb[28].mxu1  ;;  %v1601_v18 = vmul.f32 %v2071_v28, %v1494_v32  ;;  %v1496_v35 = vpop.f32.mrb[27].mxu0 }
 0x645   :  { %v1623_v61 = vmax.f32 %v1617_v8, 0.0  ;;  %v1605_v24 = vmul.f32 %v2071_v28, %v1585_v29  ;;  %v1587_v36 = vpop.f32.mrb[29].mxu1 }
 0x646   :  { %v1614_v39 = vadd.f32 %v2072_v52, %v1601_v18 }
 0x647   :  { %v1633_v34 = vsel %vm122_vm8, %v1623_v61, -inf  ;;  %v1618_v40 = vadd.f32 %v2072_v52, %v1605_v24  ;;  %v1499_v43 = vpop.f32.mrb[28].mxu0  ;;  %v1650_v56 = vsel %vm1640_vm0, %v1623_v61, -inf }
 0x648   :  { %v1634_v41 = vrot.slane %v1633_v34, 4  ;;  %v1590_v44 = vpop.f32.mrb[30].mxu1  ;;  %v1620_v46 = vmax.f32 %v1614_v39, 0.0  ;;  %v1602_v48 = vmul.f32 %v2071_v28, %v1499_v43  ;;  %v1501_v49 = vpop.f32.mrb[29].mxu0 }
 0x649   :  { %v1624_v37 = vmax.f32 %v1618_v40, 0.0  ;;  %v1606_v33 = vmul.f32 %v2071_v28, %v1590_v44  ;;  %v1592_v50 = vpop.f32.mrb[31].mxu1 }
 0x64a   :  { %v1635_v53 = vmax.f32 %v1633_v34, %v1634_v41  ;;  %v1626_v38 = vsel %vm122_vm8, %v1620_v46, -inf  ;;  %v1641_v45 = vsel %vm1640_vm0, %v1620_v46, -inf  ;;  %v1615_v5 = vadd.f32 %v2072_v52, %v1602_v48 }
 0x64b   :  { %v1651_v57 = vsel %vm116_vm5, %v1624_v37, -inf  ;;  %v1667_v58 = vsel %vm1659_vm1, %v1624_v37, -inf  ;;  %v1627_v60 = vrot.slane %v1626_v38, 4  ;;  %v1504_v3 = vpop.f32.mrb[30].mxu0  ;;  %v1619_v11 = vadd.f32 %v2072_v52, %v1606_v33 }
 0x64c   :  { %v1636_v59 = vrot.slane %v1635_v53, 2  ;;  %v1652_v54 = vmax.f32 %v1650_v56, %v1651_v57  ;;  %v1668_v0 = vrot.slane %v1667_v58, 4  ;;  %v1603_v6 = vmul.f32 %v2071_v28, %v1504_v3  ;;  %v1506_v7 = vpop.f32.mrb[31].mxu0 }
 0x64d   :  { %v1628_v51 = vmax.f32 %v1626_v38, %v1627_v60  ;;  %v1621_v12 = vmax.f32 %v1615_v5, 0.0  ;;  %v1625_v55 = vmax.f32 %v1619_v11, 0.0  ;;  %v1684_v13 = vsel %vm1674_vm2, %v1624_v37, -inf }
 0x64e   :  { %v1637_v47 = vmax.f32 %v1635_v53, %v1636_v59  ;;  %v1653_v63 = vrot.slane %v1652_v54, 4  ;;  %v1669_v10 = vmax.f32 %v1667_v58, %v1668_v0  ;;  %v1616_v62 = vadd.f32 %v2072_v52, %v1603_v6 }
 0x64f   :  { %v1629_v15 = vrot.slane %v1628_v51, 2  ;;  %v1642_v19 = vsel %vm116_vm5, %v1621_v12, -inf  ;;  %v1660_v21 = vsel %vm1659_vm1, %v1621_v12, -inf  ;;  %v1685_v4 = vsel %vm120_vm7, %v1625_v55, -inf }
 0x650   :  { %v1638_v14 = vrot.slane %v1637_v47, 1  ;;  %v1654_v17 = vmax.f32 %v1652_v54, %v1653_v63  ;;  %v1670_v16 = vrot.slane %v1669_v10, 2  ;;  %v1622_v22 = vmax.f32 %v1616_v62, 0.0  ;;  %v1821_v63 = vld [vmem:[%s3442_s14] sm:$0x3]  ;;  %s2622_s14 = scalar_lea.vmem %s2017_s2, 64 }
 0x651   :  { %v1630_v23 = vmax.f32 %v1628_v51, %v1629_v15  ;;  %v1643_v26 = vmax.f32 %v1641_v45, %v1642_v19  ;;  %v1661_v42 = vrot.slane %v1660_v21, 4  ;;  %v1686_v27 = vmax.f32 %v1684_v13, %v1685_v4  ;;  %p2623_p8 = scmp.ne.s32.totalorder %s2017_s2, %s2622_s14  ;;  %p2628_p10 = scmp.lt.s32.totalorder %s2622_s14, %s2622_s14 }
 0x652   :  { %v1639_v30 = vmax.f32 %v1637_v47, %v1638_v14  ;;  %v1671_v25 = vmax.f32 %v1669_v10, %v1670_v16  ;;  %v1675_v28 = vsel %vm1674_vm2, %v1621_v12, -inf  ;;  %v1676_v20 = vsel %vm120_vm7, %v1622_v22, -inf }
 0x653   :  { %v1631_v52 = vrot.slane %v1630_v23, 1  ;;  %v1644_v9 = vrot.slane %v1643_v26, 4  ;;  %v1677_v31 = vmax.f32 %v1675_v28, %v1676_v20  ;;  %v1662_v32 = vmax.f32 %v1660_v21, %v1661_v42  ;;  %p2629_p11 = por %p2628_p10, %p2627_p9 }
 0x654   :  { %v1672_v8 = vrot.slane %v1671_v25, 1  ;;  %v1687_v29 = vrot.slane %v1686_v27, 4  ;;  %v1655_v61 = vrot.slane %v1654_v17, 2  ;;  %v1841_v36 = vrot.slane %v1639_v30, 7 }
 0x655   :  { %v1632_v18 = vmax.f32 %v1630_v23, %v1631_v52  ;;  %v1678_v24 = vrot.slane %v1677_v31, 4  ;;  %v1645_v35 = vmax.f32 %v1643_v26, %v1644_v9  ;;  %v1663_v34 = vrot.slane %v1662_v32, 2  ;;  %p2630_p12 = pnand %p2629_p11, %p2623_p8 }
 0x656   :  { %v1688_v39 = vmax.f32 %v1686_v27, %v1687_v29  ;;  %v1656_v40 = vmax.f32 %v1654_v17, %v1655_v61  ;;  %v1673_v33 = vmax.f32 %v1671_v25, %v1672_v8  ;;  %v1829_v10 = vsub.s32 1, %v2765_v1 }
 0x657   :  { %v1679_v41 = vmax.f32 %v1677_v31, %v1678_v24  ;;  %v1646_v43 = vrot.slane %v1645_v35, 2  ;;  %v1843_v44 = vsel %vm1842_vm3, %v1841_v36, %v1632_v18  ;;  %v1664_v46 = vmax.f32 %v1662_v32, %v1663_v34 }
 0x658   :  { %v1689_v37 = vrot.slane %v1688_v39, 2  ;;  %v1657_v48 = vrot.slane %v1656_v40, 1  ;;  %v1846_v54 = vrot.slane %v1673_v33, 7  ;;  %v1826_v12 = vrot.slane %v1821_v63, %v2768_v2 }
 0x659   :  { %v1680_v49 = vrot.slane %v1679_v41, 2  ;;  %v1647_v50 = vmax.f32 %v1645_v35, %v1646_v43  ;;  %v1665_v38 = vrot.slane %v1664_v46, 1  ;;  %v1830_v55 = vrot.slane %v1821_v63, %v1829_v10 }
 0x65a   :  { %v1658_v53 = vmax.f32 %v1656_v40, %v1657_v48  ;;  %v1690_v56 = vmax.f32 %v1688_v39, %v1689_v37 }
 0x65b   :  { %v1648_v57 = vrot.slane %v1647_v50, 1  ;;  %v1681_v58 = vmax.f32 %v1679_v41, %v1680_v49  ;;  %v1666_v60 = vmax.f32 %v1664_v46, %v1665_v38 }
 0x65c   :  { %v1691_v59 = vrot.slane %v1690_v56, 1  ;;  %v1844_v3 = vrot.slane %v1658_v53, 7 }
 0x65d   :  { %v1649_v0 = vmax.f32 %v1647_v50, %v1648_v57  ;;  %v1682_v45 = vrot.slane %v1681_v58, 1  ;;  %v1847_v11 = vsel %vm1842_vm3, %v1846_v54, %v1666_v60 }
 0x65e   :  { %v1692_v5 = vmax.f32 %v1690_v56, %v1691_v59 }
 0x65f   :  { %v1845_v6 = vsel %vm1842_vm3, %v1844_v3, %v1649_v0  ;;  %v1683_v7 = vmax.f32 %v1681_v58, %v1682_v45 }
 0x660   :  { %1918 = vmatprep.mubr.f32.mxu1 %v1845_v6  ;;  %v1848_v47 = vrot.slane %v1692_v5, 7 }
 0x661   :  { %1919 = vmatmul.mubr.f32.vlgmr.msra.gmra.mrb[32].mxu1 %v1843_v44 }
 0x662   :  { %v1849_v51 = vsel %vm1842_vm3, %v1848_v47, %v1683_v7 }
 0x663   :  { %1989 = vmatprep.mubr.f32.mxu0 %v1849_v51 }
 0x664   :  { %1990 = vmatmul.mubr.f32.vlgmr.msra.gmra.mrb[32].mxu0 %v1847_v11 }
 0x734   :  { %v1920_v13 = vpop.f32.mrb[32].mxu1 }
 0x735   :  { %v1922_v62 = vpop.f32.mrb[33].mxu1  ;;  %v1921_v14 = vadd.f32 %v1920_v13, %v1826_v12 }
 0x736   :  { %v1923_v15 = vadd.f32 %v1922_v62, %v1830_v55 }
 0x737   :  { %v1991_v17 = vpop.f32.mrb[32].mxu0 }
 0x738   :  { %v1992_v16 = vadd.f32 %v1991_v17, %v1921_v14  ;;  %v1993_v19 = vpop.f32.mrb[33].mxu0 }
 0x739   :  { %v1994_v21 = vadd.f32 %v1993_v19, %v1923_v15 }
 0x73a   :  { %v1996_v4 = vmax.f32 %v1992_v16, 0.0 }
 0x73b   :  { %v1997_v22 = vmax.f32 %v1994_v21, 0.0 }
 0x73d   :  { %v2000_v30 = vcombine.low %v1996_v4, %v1997_v22 }
 0x73f   :  { %2073 = vst.sshfl [vmem:[#allocation6] sm:$0x33 pattern:$0x76325410] %v2000_v30 }
 0x740   :  { %2633 = shalt.err (!%p2630_p12)
}
 0x741   :  { %s2634_s16 = scalar_lea.hbm %s3443_s15, 64 }
 0x742   :  { %p2635_p13 = scmp.ne.s32.totalorder %s3443_s15, %s2634_s16  ;;  %p2638_p0 = scmp.lt.u32.totalorder %s2634_s16, %s3443_s15 }
 0x744   :  { %p2640_p1 = pnand %p2638_p0, %p2635_p13 }
 0x746   :  { %2643 = shalt.err (!%p2640_p1)
}
 0x747   :  { %2019 = dma.vmem_to_hbm [thread:$0]  %s2017_s2, 64, %s3443_s15, [#allocation5]  }
 0x748   :  { %2646 = dma.done.wait [#allocation5], 64  }
 0x749   :  { %2647 = vsyncadd [#allocation5], 4294967232 }
 0x74a   :  { %2023 = vsyncpa [#allocation4], 1 }
 0x74b   :  { %2024 = vsyncpa [#allocation5], 1 }

</bundles_post_ra>
